<compile_context>
chip_gen: v6e
topology: v6e:2x2x1
jax: 0.10.0
libtpu: 0.0.40
codegen_flags: <defaults>
</compile_context>

<pallas_src>
import functools

import jax
import jax.numpy as jnp
from jax import lax
from jax.experimental import pallas as pl
from jax.experimental.pallas import tpu as pltpu


def _causal_graph_kernel(x_ref, w_ref, b_ref, o_ref, *, tb, seq, dmod):
    # x_ref: (tb, S, D) bf16   w_ref: (D, D) bf16 ([in, out] = [K, N])
    # b_ref: (1, D) f32        o_ref: (tb, S, D) out dtype
    x3 = x_ref[...]                                   # (tb, S, D) bf16
    x2 = x3.reshape(tb * seq, dmod)                   # free view: rows are multiples of 8

    # Linear: (tb*S, D) @ (D, D) on the MXU, bf16 operands, f32 accumulation.
    logits = jnp.dot(x2, w_ref[...],
                     preferred_element_type=jnp.float32)      # (tb*S, D) f32
    logits = logits + b_ref[...]                              # single (1, D) broadcast

    # Exact sigmoid: exp on the EUP, true divide on the VALU (free under MXU slack).
    # exp(-z) -> +inf for very negative z; 1/inf == 0 gives the correct limit.
    causal = 1.0 / (1.0 + jnp.exp(-logits))                   # (tb*S, D) f32

    # Per-sample bmm: out[t] = causal[t] @ x[t].  One batched MXU contraction and a
    # single lane-dense full-block store (instead of tb small matmuls + tb stores).
    causal3 = causal.reshape(tb, seq, dmod).astype(jnp.bfloat16)
    out = jnp.einsum("bsk,bkd->bsd", causal3, x3,
                     preferred_element_type=jnp.float32)      # (tb, S, D) f32
    o_ref[...] = out.astype(o_ref.dtype)
    # Dropout is identity at inference time (module.eval()).


def _pick_batch_block(batch, seq, dmod, in_itemsize, out_itemsize,
                      vmem_budget_bytes=8 << 20):
    """Largest divisor of `batch` whose double-buffered (in + out) block stays under
    the VMEM budget; among those, prefer step counts that balance v7x megacore
    (1 step, or an even number of steps)."""
    per_sample = 2 * seq * dmod * (in_itemsize + out_itemsize)   # double-buffered in+out
    max_tb = max(1, min(batch, vmem_budget_bytes // per_sample))
    divisors = [t for t in range(1, batch + 1) if batch % t == 0 and t <= max_tb]
    if not divisors:
        return 1
    balanced = [t for t in divisors if (batch // t) == 1 or (batch // t) % 2 == 0]
    return max(balanced) if balanced else max(divisors)


def causal_graph_encoder(x, w, b, *, tb=None):
    """x: [B, S, D], w: [D, D] (PyTorch nn.Linear [out, in]), b: [D] -> [B, S, D]."""
    B, S, D = x.shape
    assert S == D, "torch.matmul(causal_matrix, x) requires seq == d_model"
    out_dtype = x.dtype

    # One-time wrapper-side layout / dtype prep (amortized over the whole batch):
    x_in = x.astype(jnp.bfloat16)                    # bf16 MXU operand, halves HBM reads
    w_t = w.T.astype(jnp.bfloat16)                   # [in, out] = [K, N]: no in-kernel vxpose
    b2 = b.astype(jnp.float32).reshape(1, D)

    if tb is None:
        tb = _pick_batch_block(B, S, D,
                               jnp.dtype(jnp.bfloat16).itemsize,
                               jnp.dtype(out_dtype).itemsize)
    assert B % tb == 0
    grid = (B // tb,)

    cost = pl.CostEstimate(
        flops=4 * B * S * D * D,                       # two (S,D)@(D,D) matmuls / sample
        transcendentals=B * S * D,                     # exp inside the sigmoid
        bytes_accessed=(B * S * D * 2                  # bf16 x read
                        + B * S * D * jnp.dtype(out_dtype).itemsize   # out write
                        + D * D * 2                    # bf16 W
                        + D * 4),                      # f32 bias
    )

    kernel = functools.partial(_causal_graph_kernel, tb=tb, seq=S, dmod=D)
    out = pl.pallas_call(
        kernel,
        out_shape=jax.ShapeDtypeStruct((B, S, D), out_dtype),
        grid_spec=pltpu.PrefetchScalarGridSpec(
            num_scalar_prefetch=0,
            grid=grid,
            in_specs=[
                pl.BlockSpec((tb, S, D), lambda i: (i, 0, 0)),   # TB samples per step
                pl.BlockSpec((D, D), lambda i: (0, 0)),          # weights resident in VMEM
                pl.BlockSpec((1, D), lambda i: (0, 0)),          # bias resident in VMEM
            ],
            out_specs=pl.BlockSpec((tb, S, D), lambda i: (i, 0, 0)),
        ),
        compiler_params=pltpu.CompilerParams(
            dimension_semantics=("parallel",)),                  # shard grid across TCs (v7x)
        cost_estimate=cost,
    )(x_in, w_t, b2)
    # TODO(synk): if S=D is scaled toward ~2K, tile W along K/N with an "arbitrary"
    # inner grid axis + f32 VMEM accumulator and set vmem_limit_bytes (v7x: 64 MiB
    # physical / 32 MiB scoped default).
    return out


def _reference(x, w, b):
    cm = jax.nn.sigmoid(jnp.einsum("bsd,od->bso", x, w) + b)
    return jnp.einsum("bsk,bkd->bsd", cm, x)


if __name__ == "__main__":
    key = jax.random.PRNGKey(0)
    # seq must equal d_model for this module's forward; B=8 exercises batch-blocking.
    B, S, D = 8, 128, 128
    kx, kw, kb = jax.random.split(key, 3)
    x = jax.random.normal(kx, (B, S, D), dtype=jnp.float32)
    # Deterministic synthetic parameters (shapes from nn.Linear(d_model, d_model)).
    w = jax.random.normal(kw, (D, D), dtype=jnp.float32) * (1.0 / jnp.sqrt(D))
    bias = jax.random.normal(kb, (D,), dtype=jnp.float32) * 0.01

    out = jax.block_until_ready(causal_graph_encoder(x, w, bias))
    ref = _reference(x, w, bias)

    assert out.shape == (B, S, D)
    # Tolerance sized for bf16 MXU operands with f32 accumulation over the
    # 128-term contractions (sigmoid itself is computed exactly in f32).
    scale = jnp.max(jnp.abs(ref))
    max_err = jnp.max(jnp.abs(out - ref))
    assert max_err <= 1e-2 * scale + 1e-4, (float(max_err), float(scale))
    print("KERNEL_OK")
</pallas_src>

<mosaic_0001>
module attributes {stable_mosaic.version = 11 : i64} {
  func.func @_causal_graph_kernel(%arg0: i32, %arg1: memref<8x128x128xbf16, #tpu.memory_space<vmem>>, %arg2: memref<128x128xbf16, #tpu.memory_space<vmem>>, %arg3: memref<1x128xf32, #tpu.memory_space<vmem>>, %arg4: memref<8x128x128xf32, #tpu.memory_space<vmem>>) attributes {dimension_semantics = [#tpu.dimension_semantics<parallel>], iteration_bounds = array<i64: 1>, scalar_prefetch = 0 : i64, scratch_operands = 0 : i64, tpu.core_type = #tpu.core_type<tc>, window_params = [{transform_indices = @transform_0, window_bounds = array<i64: 8, 128, 128>}, {pipeline_mode = #tpu.pipeline_mode<synchronous>, transform_indices = @transform_1, window_bounds = array<i64: 128, 128>}, {pipeline_mode = #tpu.pipeline_mode<synchronous>, transform_indices = @transform_2, window_bounds = array<i64: 1, 128>}, {transform_indices = @transform_3, window_bounds = array<i64: 8, 128, 128>}]} {
    %c0 = arith.constant 0 : index
    %c0_0 = arith.constant 0 : index
    %c0_1 = arith.constant 0 : index
    %0 = vector.load %arg1[%c0, %c0_0, %c0_1] : memref<8x128x128xbf16, #tpu.memory_space<vmem>>, vector<8x128x128xbf16>
    %1 = vector.shape_cast %0 : vector<8x128x128xbf16> to vector<1024x128xbf16>
    %c0_2 = arith.constant 0 : index
    %c0_3 = arith.constant 0 : index
    %2 = vector.load %arg2[%c0_2, %c0_3] : memref<128x128xbf16, #tpu.memory_space<vmem>>, vector<128x128xbf16>
    %cst = arith.constant dense<0.000000e+00> : vector<1024x128xf32>
    %3 = tpu.matmul %1, %2, %cst {dimension_numbers = #tpu.dot_dimension_numbers<[1], [0], [0], [1], [0, 0, 1, 1], [], []>} : vector<1024x128xbf16>, vector<128x128xbf16>, vector<1024x128xf32> -> vector<1024x128xf32>
    %c0_4 = arith.constant 0 : index
    %c0_5 = arith.constant 0 : index
    %4 = vector.load %arg3[%c0_4, %c0_5] : memref<1x128xf32, #tpu.memory_space<vmem>>, vector<1x128xf32>
    %5 = vector.broadcast %4 : vector<1x128xf32> to vector<1024x128xf32>
    %6 = arith.addf %3, %5 : vector<1024x128xf32>
    %cst_6 = arith.constant 0.000000e+00 : f32
    %7 = vector.broadcast %cst_6 : f32 to vector<1024x128xf32>
    %8 = arith.subf %7, %6 : vector<1024x128xf32>
    %9 = math.exp %8 : vector<1024x128xf32>
    %cst_7 = arith.constant 1.000000e+00 : f32
    %10 = vector.broadcast %cst_7 : f32 to vector<1024x128xf32>
    %11 = arith.addf %10, %9 : vector<1024x128xf32>
    %cst_8 = arith.constant 1.000000e+00 : f32
    %12 = vector.broadcast %cst_8 : f32 to vector<1024x128xf32>
    %13 = arith.divf %12, %11 : vector<1024x128xf32>
    %14 = vector.shape_cast %13 : vector<1024x128xf32> to vector<8x128x128xf32>
    %15 = arith.truncf %14 : vector<8x128x128xf32> to vector<8x128x128xbf16>
    "tpu.trace_start"() <{level = 10 : i32, message = "bsk,bkd->bsd"}> : () -> ()
    %cst_9 = arith.constant dense<0.000000e+00> : vector<8x128x128xf32>
    %16 = tpu.matmul %15, %0, %cst_9 {dimension_numbers = #tpu.dot_dimension_numbers<[2], [1], [1], [2], [0, 0, 0, 1, 1, 2], [0], [0]>} : vector<8x128x128xbf16>, vector<8x128x128xbf16>, vector<8x128x128xf32> -> vector<8x128x128xf32>
    "tpu.trace_stop"() : () -> ()
    %c0_10 = arith.constant 0 : index
    %c0_11 = arith.constant 0 : index
    %c0_12 = arith.constant 0 : index
    %17 = vector.load %arg4[%c0_10, %c0_11, %c0_12] : memref<8x128x128xf32, #tpu.memory_space<vmem>>, vector<8x128x128xf32>
    tpu.vector_store %arg4[%c0_10, %c0_11, %c0_12], %16 {strides = array<i32>} : memref<8x128x128xf32, #tpu.memory_space<vmem>>, vector<8x128x128xf32>,
    return
  }
  func.func @transform_0(%arg0: i32) -> (i32, i32, i32) {
    %c0_i32 = arith.constant 0 : i32
    %c0_i32_0 = arith.constant 0 : i32
    %c0_i32_1 = arith.constant 0 : i32
    return %arg0, %c0_i32, %c0_i32_0 : i32, i32, i32
  }
  func.func @transform_1(%arg0: i32) -> (i32, i32) {
    %c0_i32 = arith.constant 0 : i32
    %c0_i32_0 = arith.constant 0 : i32
    %c0_i32_1 = arith.constant 0 : i32
    return %c0_i32, %c0_i32_0 : i32, i32
  }
  func.func @transform_2(%arg0: i32) -> (i32, i32) {
    %c0_i32 = arith.constant 0 : i32
    %c0_i32_0 = arith.constant 0 : i32
    %c0_i32_1 = arith.constant 0 : i32
    return %c0_i32, %c0_i32_0 : i32, i32
  }
  func.func @transform_3(%arg0: i32) -> (i32, i32, i32) {
    %c0_i32 = arith.constant 0 : i32
    %c0_i32_0 = arith.constant 0 : i32
    %c0_i32_1 = arith.constant 0 : i32
    return %arg0, %c0_i32, %c0_i32_0 : i32, i32, i32
  }
}

</mosaic_0001>

<bundles_post_ra>
// kernel: tpu_custom_call.1
= control target key start
LH: loop header
LB: loop body
LE: loop exit
PB: predicated region body
PF: predicated region fallthrough
CT: control target
= control target key end

     0   :  { %8 = vsyncpa [#allocation3], 0  ;;  %s4551_s0 = inlined_call_operand.hbm [shape: bf16[8,128,128], index: 0, kind: input, shape index: {}]   ;;  %s4552_s1 = inlined_call_operand.hbm [shape: bf16[128,128], index: 1, kind: input, shape index: {}]   ;;  %s4553_s2 = inlined_call_operand.vmem [shape: f32[1,128], index: 2, kind: input, shape index: {}]   ;;  %s4554_s3 = inlined_call_operand.hbm [shape: f32[8,128,128], index: 3, kind: output, shape index: {}]  }
   0x1   :  { %9 = vsyncpa [#allocation6], 0 }
   0x2   :  { %10 = vsyncpa [#allocation4], 0  ;;  %s4302_s12 = smov [#allocation2]  }
   0x3   :  { %s16_s13 = sshll.u32 %s4302_s12, 4  ;;  %s17_s13 = int_to_ptr.vmem [resolvable:$true] %s16_s13 }
   0x4   :  { %s4244_s14 = scalar_lea.vmem %s17_s13, 8192  ;;  %p4249_p1 = scmp.lt.s32.totalorder %s17_s13, %s17_s13 }
   0x5   :  { %p4245_p0 = scmp.ne.s32.totalorder %s17_s13, %s4244_s14  ;;  %p4250_p2 = scmp.lt.s32.totalorder %s4244_s14, %s4244_s14 }
   0x7   :  { %p4251_p3 = por %p4250_p2, %p4249_p1 }
   0x9   :  { %p4252_p4 = pnand %p4251_p3, %p4245_p0 }
   0xb   :  { %4255 = shalt.err (!%p4252_p4)
}
   0xc   :  { %s4303_s15 = smov 64   ;;  %s4304_s16 = smov 4  }
   0xd   :  { %22 = dma.hbm_to_vmem [thread:$0]  %s4551_s0, 8192, %s17_s13, [#allocation3], %s4303_s15, %s4303_s15, %s4304_s16  }
   0xe   :  { %s4305_s19 = smov [#allocation5]  }
   0xf   :  { %s28_s20 = sshll.u32 %s4305_s19, 4  ;;  %s29_s20 = int_to_ptr.vmem [resolvable:$true] %s28_s20 }
  0x10   :  { %s4264_s21 = scalar_lea.vmem %s29_s20, 1024  ;;  %p4269_p6 = scmp.lt.s32.totalorder %s29_s20, %s29_s20 }
  0x11   :  { %p4265_p5 = scmp.ne.s32.totalorder %s29_s20, %s4264_s21  ;;  %p4270_p7 = scmp.lt.s32.totalorder %s4264_s21, %s4264_s21 }
  0x13   :  { %p4271_p8 = por %p4270_p7, %p4269_p6 }
  0x15   :  { %p4272_p9 = pnand %p4271_p8, %p4265_p5 }
  0x17   :  { %4275 = shalt.err (!%p4272_p9)
}
  0x18   :  { %34 = dma.hbm_to_vmem [thread:$0]  %s4552_s1, 1024, %s29_s20, [#allocation6], %s4303_s15, %s4303_s15, %s4304_s16  }
  0x19   :  { %4296 = dma.done.wait [#allocation3], 8192  }
  0x1a   :  { %4297 = vsyncadd [#allocation3], 4294959104 }
  0x1b   :  { %4298 = dma.done.wait [#allocation6], 1024  }
  0x1c   :  { %4299 = vsyncadd [#allocation6], 4294966272  ;;  %v3606_v0 = vld [vmem:[#allocation5 + $0x38] sm:$0xff]   ;;  %v3607_v1 = vld [vmem:[#allocation5 + $0x30] sm:$0xff]  }
  0x1d   :  { %3199 = vmatprep.subr.bf16.mxu0 %v3606_v0  ;;  %v3608_v2 = vld [vmem:[#allocation5 + $0x28] sm:$0xff]   ;;  %v3609_v3 = vld [vmem:[#allocation5 + $0x20] sm:$0xff]   ;;  %v3610_v5 = vld [vmem:[#allocation5 + $0x18] sm:$0xff]  }
  0x1e   :  { %3200 = vmatpush3.bf16.msra.mxu0 %v3606_v0  ;;  %v3614_v4 = vld [vmem:[#allocation2] sm:$0xff]   ;;  %v3621_v6 = vld [vmem:[#allocation2 + $0x38] sm:$0xff]   ;;  %v3611_v7 = vld [vmem:[#allocation5 + $0x10] sm:$0xff]  }
  0x1f   :  { %3201 = vmatprep.subr.bf16.mxu0 %v3607_v1  ;;  %3215 = vmatprep.mubr.bf16.mxu0 %v3614_v4  ;;  %v3620_v8 = vld [vmem:[#allocation2 + $0x30] sm:$0xff]   ;;  %v3612_v9 = vld [vmem:[#allocation5 + $0x8] sm:$0xff]   ;;  %v3613_v11 = vld [vmem:[#allocation5] sm:$0xff]  }
  0x20   :  { %3343 = vmatprep.subr.bf16.mxu1 %v3621_v6  ;;  %v3619_v10 = vld [vmem:[#allocation2 + $0x28] sm:$0xff]   ;;  %v3618_v12 = vld [vmem:[#allocation2 + $0x20] sm:$0xff]   ;;  %v3617_v13 = vld [vmem:[#allocation2 + $0x18] sm:$0xff]  }
  0x21   :  { %3344 = vmatpush3.bf16.msra.mxu1 %v3621_v6  ;;  %v3615_v14 = vld [vmem:[#allocation2 + $0x8] sm:$0xff]   ;;  %v3616_v15 = vld [vmem:[#allocation2 + $0x10] sm:$0xff]   ;;  %v4335_v16 = vld [vmem:[#allocation2 + $0x78] sm:$0xff]  }
  0x22   :  { %3202 = vmatpush3.bf16.msra.mxu0 %v3607_v1  ;;  %3345 = vmatprep.subr.bf16.mxu1 %v3620_v8  ;;  %v4338_v17 = vld [vmem:[#allocation2 + $0x40] sm:$0xff]   ;;  %v4341_v18 = vld [vmem:[#allocation2 + $0x48] sm:$0xff]   ;;  %v4343_v19 = vld [vmem:[#allocation2 + $0x50] sm:$0xff]  }
  0x23   :  { %3203 = vmatprep.subr.bf16.mxu0 %v3608_v2  ;;  %v4347_v20 = vld [vmem:[#allocation2 + $0x58] sm:$0xff]   ;;  %v4349_v21 = vld [vmem:[#allocation2 + $0x60] sm:$0xff]   ;;  %v4353_v22 = vld [vmem:[#allocation2 + $0x68] sm:$0xff]  }
  0x24   :  { %v4355_v23 = vld [vmem:[#allocation2 + $0x70] sm:$0xff]   ;;  %v3630_v24 = vld [vmem:[#allocation2 + $0x80] sm:$0xff]   ;;  %v3631_v25 = vld [vmem:[#allocation2 + $0x88] sm:$0xff]  }
  0x25   :  { %3346 = vmatpush3.bf16.msra.mxu1 %v3620_v8  ;;  %v3632_v26 = vld [vmem:[#allocation2 + $0x90] sm:$0xff]   ;;  %v4360_v27 = vld [vmem:[#allocation2 + $0x98] sm:$0xff]   ;;  %v4362_v28 = vld [vmem:[#allocation2 + $0xa0] sm:$0xff]  }
  0x26   :  { %3204 = vmatpush3.bf16.msra.mxu0 %v3608_v2  ;;  %3347 = vmatprep.subr.bf16.mxu1 %v3619_v10  ;;  %v4366_v29 = vld [vmem:[#allocation2 + $0xa8] sm:$0xff]   ;;  %v4368_v30 = vld [vmem:[#allocation2 + $0xb0] sm:$0xff]   ;;  %v4372_v31 = vld [vmem:[#allocation2 + $0xb8] sm:$0xff]  }
  0x27   :  { %3205 = vmatprep.subr.bf16.mxu0 %v3609_v3  ;;  %v3638_v32 = vld [vmem:[#allocation2 + $0xc0] sm:$0xff]   ;;  %v3639_v33 = vld [vmem:[#allocation2 + $0xc8] sm:$0xff]   ;;  %v3640_v34 = vld [vmem:[#allocation2 + $0xd0] sm:$0xff]  }
  0x28   :  { %v3641_v35 = vld [vmem:[#allocation2 + $0xd8] sm:$0xff]   ;;  %v3642_v36 = vld [vmem:[#allocation2 + $0xe0] sm:$0xff]   ;;  %v3643_v37 = vld [vmem:[#allocation2 + $0xe8] sm:$0xff]  }
  0x29   :  { %3348 = vmatpush3.bf16.msra.mxu1 %v3619_v10  ;;  %v3644_v38 = vld [vmem:[#allocation2 + $0xf0] sm:$0xff]   ;;  %v3645_v39 = vld [vmem:[#allocation2 + $0xf8] sm:$0xff]   ;;  %v3646_v40 = vld [vmem:[#allocation2 + $0x100] sm:$0xff]  }
  0x2a   :  { %3206 = vmatpush3.bf16.msra.mxu0 %v3609_v3  ;;  %3349 = vmatprep.subr.bf16.mxu1 %v3618_v12  ;;  %v3647_v41 = vld [vmem:[#allocation2 + $0x108] sm:$0xff]   ;;  %v3648_v42 = vld [vmem:[#allocation2 + $0x110] sm:$0xff]   ;;  %v3649_v43 = vld [vmem:[#allocation2 + $0x118] sm:$0xff]  }
  0x2b   :  { %3207 = vmatprep.subr.bf16.mxu0 %v3610_v5  ;;  %v3650_v44 = vld [vmem:[#allocation2 + $0x120] sm:$0xff]   ;;  %v3651_v45 = vld [vmem:[#allocation2 + $0x128] sm:$0xff]   ;;  %v3652_v46 = vld [vmem:[#allocation2 + $0x130] sm:$0xff]  }
  0x2c   :  { %v3653_v47 = vld [vmem:[#allocation2 + $0x138] sm:$0xff]   ;;  %v3654_v48 = vld [vmem:[#allocation2 + $0x140] sm:$0xff]   ;;  %v3655_v49 = vld [vmem:[#allocation2 + $0x148] sm:$0xff]  }
  0x2d   :  { %3350 = vmatpush3.bf16.msra.mxu1 %v3618_v12  ;;  %v3656_v50 = vld [vmem:[#allocation2 + $0x150] sm:$0xff]   ;;  %v3657_v51 = vld [vmem:[#allocation2 + $0x158] sm:$0xff]   ;;  %v3658_v52 = vld [vmem:[#allocation2 + $0x160] sm:$0xff]  }
  0x2e   :  { %3208 = vmatpush3.bf16.msra.mxu0 %v3610_v5  ;;  %3351 = vmatprep.subr.bf16.mxu1 %v3617_v13  ;;  %v3659_v53 = vld [vmem:[#allocation2 + $0x168] sm:$0xff]   ;;  %v3660_v54 = vld [vmem:[#allocation2 + $0x170] sm:$0xff]   ;;  %v3661_v55 = vld [vmem:[#allocation2 + $0x178] sm:$0xff]  }
  0x2f   :  { %3209 = vmatprep.subr.bf16.mxu0 %v3611_v7  ;;  %v3662_v56 = vld [vmem:[#allocation2 + $0x180] sm:$0xff]   ;;  %v3663_v57 = vld [vmem:[#allocation2 + $0x188] sm:$0xff]   ;;  %v3664_v58 = vld [vmem:[#allocation2 + $0x190] sm:$0xff]  }
  0x30   :  { %v4378_v59 = vld [vmem:[%s4553_s2] ss:$0 sm:$0xff]  ;;  %v3665_v2 = vld [vmem:[#allocation2 + $0x198] sm:$0xff]  }
  0x31   :  { %3352 = vmatpush3.bf16.msra.mxu1 %v3617_v13 }
  0x32   :  { %3210 = vmatpush3.bf16.msra.mxu0 %v3611_v7  ;;  %3353 = vmatprep.subr.bf16.mxu1 %v3616_v15 }
  0x33   :  { %3211 = vmatprep.subr.bf16.mxu0 %v3612_v9 }
  0x35   :  { %3354 = vmatpush3.bf16.msra.mxu1 %v3616_v15 }
  0x36   :  { %3212 = vmatpush3.bf16.msra.mxu0 %v3612_v9  ;;  %3355 = vmatprep.subr.bf16.mxu1 %v3615_v14 }
  0x37   :  { %3213 = vmatprep.subr.bf16.mxu0 %v3613_v11 }
  0x39   :  { %3356 = vmatpush3.bf16.msra.mxu1 %v3615_v14 }
  0x3a   :  { %3214 = vmatpush3.bf16.msra.mxu0 %v3613_v11  ;;  %3357 = vmatprep.subr.bf16.mxu1 %v3614_v4 }
  0x3d   :  { %3216 = vmatmul.mubr.bf16.vlgmr.msra.gmra.mxu0 %v3615_v14  ;;  %3358 = vmatpush3.bf16.msra.mxu1 %v3614_v4 }
  0x3e   :  { %3219 = vmatprep.mubr.bf16.mxu0 %v3616_v15  ;;  %3375 = vmatprep.subr.bf16.mxu1 %v4335_v16 }
  0x45   :  { %3220 = vmatmul.mubr.bf16.gmra.mxu0 %v3617_v13 }
  0x46   :  { %3223 = vmatprep.mubr.bf16.mxu0 %v3618_v12 }
  0x4d   :  { %3224 = vmatmul.mubr.bf16.gmra.mxu0 %v3619_v10 }
  0x4e   :  { %3227 = vmatprep.mubr.bf16.mxu0 %v3620_v8 }
  0x55   :  { %3228 = vmatmul.mubr.bf16.gmra.mxu0 %v3621_v6  ;;  %v3666_v6 = vld [vmem:[#allocation2 + $0x1a0] sm:$0xff]  }
  0x56   :  { %3231 = vmatprep.mubr.bf16.mxu0 %v4338_v17 }
  0x5d   :  { %3232 = vmatmul.mubr.bf16.gmra.mxu0 %v4341_v18 }
  0x5e   :  { %3235 = vmatprep.mubr.bf16.mxu0 %v4343_v19 }
  0x65   :  { %3236 = vmatmul.mubr.bf16.gmra.mxu0 %v4347_v20 }
  0x66   :  { %3239 = vmatprep.mubr.bf16.mxu0 %v4349_v21 }
  0x6d   :  { %3240 = vmatmul.mubr.bf16.gmra.mxu0 %v4353_v22 }
  0x6e   :  { %3243 = vmatprep.mubr.bf16.mxu0 %v4355_v23 }
  0x75   :  { %3244 = vmatmul.mubr.bf16.gmra.mxu0 %v4335_v16 }
  0x76   :  { %3247 = vmatprep.mubr.bf16.mxu0 %v3630_v24 }
  0x7d   :  { %3248 = vmatmul.mubr.bf16.gmra.mxu0 %v3631_v25 }
  0x7e   :  { %3251 = vmatprep.mubr.bf16.mxu0 %v3632_v26 }
  0x85   :  { %3252 = vmatmul.mubr.bf16.gmra.mxu0 %v4360_v27 }
  0x86   :  { %3255 = vmatprep.mubr.bf16.mxu0 %v4362_v28 }
  0x8d   :  { %3256 = vmatmul.mubr.bf16.gmra.mxu0 %v4366_v29 }
  0x8e   :  { %3259 = vmatprep.mubr.bf16.mxu0 %v4368_v30 }
  0x95   :  { %3260 = vmatmul.mubr.bf16.gmra.mxu0 %v4372_v31 }
  0x96   :  { %3263 = vmatprep.mubr.bf16.mxu0 %v3638_v32 }
  0x9d   :  { %3264 = vmatmul.mubr.bf16.gmra.mxu0 %v3639_v33  ;;  %v3667_v33 = vld [vmem:[#allocation2 + $0x1a8] sm:$0xff]  }
  0x9e   :  { %3267 = vmatprep.mubr.bf16.mxu0 %v3640_v34 }
  0xa5   :  { %3268 = vmatmul.mubr.bf16.gmra.mxu0 %v3641_v35 }
  0xa6   :  { %3271 = vmatprep.mubr.bf16.mxu0 %v3642_v36 }
  0xad   :  { %3272 = vmatmul.mubr.bf16.gmra.mxu0 %v3643_v37  ;;  %v3668_v37 = vld [vmem:[#allocation2 + $0x1b0] sm:$0xff]  }
  0xae   :  { %3275 = vmatprep.mubr.bf16.mxu0 %v3644_v38 }
  0xb5   :  { %3276 = vmatmul.mubr.bf16.gmra.mxu0 %v3645_v39 }
  0xb6   :  { %3279 = vmatprep.mubr.bf16.mxu0 %v3646_v40 }
  0xbd   :  { %3280 = vmatmul.mubr.bf16.gmra.mxu0 %v3647_v41 }
  0xbe   :  { %3283 = vmatprep.mubr.bf16.mxu0 %v3648_v42 }
  0xc5   :  { %3284 = vmatmul.mubr.bf16.gmra.mxu0 %v3649_v43 }
  0xc6   :  { %3287 = vmatprep.mubr.bf16.mxu0 %v3650_v44 }
  0xcd   :  { %3288 = vmatmul.mubr.bf16.gmra.mxu0 %v3651_v45 }
  0xce   :  { %3291 = vmatprep.mubr.bf16.mxu0 %v3652_v46 }
  0xd5   :  { %3292 = vmatmul.mubr.bf16.gmra.mxu0 %v3653_v47 }
  0xd6   :  { %3295 = vmatprep.mubr.bf16.mxu0 %v3654_v48 }
  0xdd   :  { %3296 = vmatmul.mubr.bf16.gmra.mxu0 %v3655_v49 }
  0xde   :  { %3299 = vmatprep.mubr.bf16.mxu0 %v3656_v50 }
  0xe5   :  { %3300 = vmatmul.mubr.bf16.gmra.mxu0 %v3657_v51 }
  0xe6   :  { %3303 = vmatprep.mubr.bf16.mxu0 %v3658_v52  ;;  %v3669_v52 = vld [vmem:[#allocation2 + $0x1b8] sm:$0xff]  }
  0xed   :  { %3304 = vmatmul.mubr.bf16.gmra.mxu0 %v3659_v53 }
  0xee   :  { %3307 = vmatprep.mubr.bf16.mxu0 %v3660_v54 }
  0xf5   :  { %3308 = vmatmul.mubr.bf16.gmra.mxu0 %v3661_v55 }
  0xf6   :  { %3311 = vmatprep.mubr.bf16.mxu0 %v3662_v56  ;;  %v3670_v56 = vld [vmem:[#allocation2 + $0x1c0] sm:$0xff]  }
  0xfd   :  { %v3217_v60 = vpop.f32.mrf.mxu0  ;;  %3312 = vmatmul.mubr.bf16.gmra.mxu0 %v3663_v57 }
  0xfe   :  { %v670_v61 = vadd.f32 %v3217_v60, %v4378_v59  ;;  %3315 = vmatprep.mubr.bf16.mxu0 %v3664_v58 }
  0xff   :  { %v661_v62 = vpop.f32.mrf.mxu0 }
 0x100   :  { %v1174_v63 = vsub.f32 0.0, %v670_v61  ;;  %v662_v0 = vadd.f32 %v4378_v59, %v661_v62 }
 0x101   :  { %v3218_v1 = vpop.f32.mrf.mxu0 }
 0x102   :  { %v1304_v3 = vmul.f32 1.442695, %v1174_v63  ;;  %v1172_v4 = vsub.f32 0.0, %v662_v0  ;;  %v673_v5 = vadd.f32 %v3218_v1, %v4378_v59 }
 0x103   :  { %v664_v7 = vpop.f32.mrf.mxu0 }
 0x104   :  { %3678 = vpow2.f32 %v1304_v3  ;;  %v1300_v8 = vmul.f32 1.442695, %v1172_v4  ;;  %v1175_v9 = vsub.f32 0.0, %v673_v5  ;;  %v665_v10 = vadd.f32 %v4378_v59, %v664_v7 }
 0x105   :  { %v3221_v11 = vpop.f32.mrf.mxu0  ;;  %3316 = vmatmul.mubr.bf16.gmra.mxu0 %v3665_v2 }
 0x106   :  { %3680 = vpow2.f32 %v1300_v8  ;;  %v1306_v12 = vmul.f32 1.442695, %v1175_v9  ;;  %v1173_v13 = vsub.f32 0.0, %v665_v10  ;;  %v686_v14 = vadd.f32 %v3221_v11, %v4378_v59  ;;  %3319 = vmatprep.mubr.bf16.mxu0 %v3666_v6 }
 0x107   :  { %v677_v15 = vpop.f32.mrf.mxu0 }
 0x108   :  { %3682 = vpow2.f32 %v1306_v12  ;;  %v1302_v24 = vmul.f32 1.442695, %v1173_v13  ;;  %v1178_v25 = vsub.f32 0.0, %v686_v14  ;;  %v678_v26 = vadd.f32 %v4378_v59, %v677_v15  ;;  %v3671_v15 = vld [vmem:[#allocation2 + $0x1c8] sm:$0xff]  }
 0x109   :  { %v3222_v32 = vpop.f32.mrf.mxu0 }
 0x10a   :  { %3684 = vpow2.f32 %v1302_v24  ;;  %v1312_v34 = vmul.f32 1.442695, %v1178_v25  ;;  %v1176_v35 = vsub.f32 0.0, %v678_v26  ;;  %v689_v36 = vadd.f32 %v3222_v32, %v4378_v59  ;;  %v3672_v32 = vld [vmem:[#allocation2 + $0x1d0] sm:$0xff]  }
 0x10b   :  { %v680_v38 = vpop.f32.mrf.mxu0 }
 0x10c   :  { %3686 = vpow2.f32 %v1312_v34  ;;  %v1308_v39 = vmul.f32 1.442695, %v1176_v35  ;;  %v1179_v40 = vsub.f32 0.0, %v689_v36  ;;  %v681_v41 = vadd.f32 %v4378_v59, %v680_v38 }
 0x10d   :  { %v3225_v42 = vpop.f32.mrf.mxu0  ;;  %3320 = vmatmul.mubr.bf16.gmra.mxu0 %v3667_v33 }
 0x10e   :  { %3688 = vpow2.f32 %v1308_v39  ;;  %v1314_v43 = vmul.f32 1.442695, %v1179_v40  ;;  %v1177_v44 = vsub.f32 0.0, %v681_v41  ;;  %v702_v45 = vadd.f32 %v3225_v42, %v4378_v59  ;;  %3323 = vmatprep.mubr.bf16.mxu0 %v3668_v37 }
 0x10f   :  { %v693_v46 = vpop.f32.mrf.mxu0 }
 0x110   :  { %3690 = vpow2.f32 %v1314_v43  ;;  %v1310_v47 = vmul.f32 1.442695, %v1177_v44  ;;  %v1182_v48 = vsub.f32 0.0, %v702_v45  ;;  %v694_v49 = vadd.f32 %v4378_v59, %v693_v46 }
 0x111   :  { %v3679_v50 = vpop.eup %3678  ;;  %v3226_v51 = vpop.f32.mrf.mxu0 }
 0x112   :  { %v1558_v53 = vadd.f32 1.0, %v3679_v50  ;;  %3692 = vpow2.f32 %v1310_v47  ;;  %v1320_v54 = vmul.f32 1.442695, %v1182_v48  ;;  %v1180_v55 = vsub.f32 0.0, %v694_v49 }
 0x113   :  { %v3681_v57 = vpop.eup %3680  ;;  %v705_v58 = vadd.f32 %v3226_v51, %v4378_v59  ;;  %v696_v60 = vpop.f32.mrf.mxu0 }
 0x114   :  { %3694 = vrcp.f32 %v1558_v53  ;;  %v1556_v61 = vadd.f32 1.0, %v3681_v57  ;;  %v1316_v62 = vmul.f32 1.442695, %v1180_v55  ;;  %v697_v63 = vadd.f32 %v4378_v59, %v696_v60 }
 0x115   :  { %v3683_v0 = vpop.eup %3682  ;;  %3696 = vpow2.f32 %v1320_v54  ;;  %v1183_v1 = vsub.f32 0.0, %v705_v58  ;;  %v3229_v2 = vpop.f32.mrf.mxu0  ;;  %3324 = vmatmul.mubr.bf16.gmra.mxu0 %v3669_v52  ;;  %v3673_v54 = vld [vmem:[#allocation2 + $0x1d8] sm:$0xff]   ;;  %v3674_v58 = vld [vmem:[#allocation2 + $0x1e0] sm:$0xff]  }
 0x116   :  { %3698 = vrcp.f32 %v1556_v61  ;;  %v1559_v3 = vadd.f32 1.0, %v3683_v0  ;;  %v1181_v4 = vsub.f32 0.0, %v697_v63  ;;  %v718_v5 = vadd.f32 %v3229_v2, %v4378_v59  ;;  %3327 = vmatprep.mubr.bf16.mxu0 %v3670_v56 }
 0x117   :  { %v3685_v6 = vpop.eup %3684  ;;  %3700 = vpow2.f32 %v1316_v62  ;;  %v1322_v7 = vmul.f32 1.442695, %v1183_v1  ;;  %v709_v8 = vpop.f32.mrf.mxu0 }
 0x118   :  { %3702 = vrcp.f32 %v1559_v3  ;;  %v1557_v9 = vadd.f32 1.0, %v3685_v6  ;;  %v1318_v10 = vmul.f32 1.442695, %v1181_v4  ;;  %v1186_v11 = vsub.f32 0.0, %v718_v5 }
 0x119   :  { %v3687_v12 = vpop.eup %3686  ;;  %3704 = vpow2.f32 %v1322_v7  ;;  %v710_v13 = vadd.f32 %v4378_v59, %v709_v8  ;;  %v3230_v14 = vpop.f32.mrf.mxu0 }
 0x11a   :  { %3706 = vrcp.f32 %v1557_v9  ;;  %v1562_v24 = vadd.f32 1.0, %v3687_v12  ;;  %v1328_v25 = vmul.f32 1.442695, %v1186_v11  ;;  %v721_v26 = vadd.f32 %v3230_v14, %v4378_v59 }
 0x11b   :  { %v3689_v33 = vpop.eup %3688  ;;  %3708 = vpow2.f32 %v1318_v10  ;;  %v1184_v34 = vsub.f32 0.0, %v710_v13  ;;  %v712_v35 = vpop.f32.mrf.mxu0 }
 0x11c   :  { %3710 = vrcp.f32 %v1562_v24  ;;  %v1560_v36 = vadd.f32 1.0, %v3689_v33  ;;  %v1187_v37 = vsub.f32 0.0, %v721_v26  ;;  %v713_v38 = vadd.f32 %v4378_v59, %v712_v35 }
 0x11d   :  { %v3691_v39 = vpop.eup %3690  ;;  %3712 = vpow2.f32 %v1328_v25  ;;  %v1324_v40 = vmul.f32 1.442695, %v1184_v34  ;;  %v3233_v41 = vpop.f32.mrf.mxu0  ;;  %3328 = vmatmul.mubr.bf16.gmra.mxu0 %v3671_v15 }
 0x11e   :  { %3714 = vrcp.f32 %v1560_v36  ;;  %v1563_v42 = vadd.f32 1.0, %v3691_v39  ;;  %v1330_v43 = vmul.f32 1.442695, %v1187_v37  ;;  %v1185_v44 = vsub.f32 0.0, %v713_v38  ;;  %3331 = vmatprep.mubr.bf16.mxu0 %v3672_v32  ;;  %v3675_v36 = vld [vmem:[#allocation2 + $0x1e8] sm:$0xff]  }
 0x11f   :  { %v3693_v45 = vpop.eup %3692  ;;  %3716 = vpow2.f32 %v1324_v40  ;;  %v734_v46 = vadd.f32 %v3233_v41, %v4378_v59  ;;  %v725_v47 = vpop.f32.mrf.mxu0  ;;  %v3676_v41 = vld [vmem:[#allocation2 + $0x1f0] sm:$0xff]  }
 0x120   :  { %3718 = vrcp.f32 %v1563_v42  ;;  %v1561_v48 = vadd.f32 1.0, %v3693_v45  ;;  %v1326_v49 = vmul.f32 1.442695, %v1185_v44  ;;  %v726_v50 = vadd.f32 %v4378_v59, %v725_v47 }
 0x121   :  { %v3695_v51 = vpop.eup %3694  ;;  %3720 = vpow2.f32 %v1330_v43  ;;  %v1190_v52 = vsub.f32 0.0, %v734_v46  ;;  %v3234_v53 = vpop.f32.mrf.mxu0 }
 0x122   :  { %v3697_v55 = vpop.eup %3696  ;;  %3722 = vrcp.f32 %v1561_v48  ;;  %v1188_v56 = vsub.f32 0.0, %v726_v50  ;;  %v737_v57 = vadd.f32 %v3234_v53, %v4378_v59 }
 0x123   :  { %v3699_v60 = vpop.eup %3698  ;;  %v1566_v61 = vadd.f32 1.0, %v3697_v55  ;;  %3724 = vpow2.f32 %v1326_v49  ;;  %v1336_v62 = vmul.f32 1.442695, %v1190_v52  ;;  %v728_v63 = vpop.f32.mrf.mxu0 }
 0x124   :  { %v3701_v0 = vpop.eup %3700  ;;  %v1332_v1 = vmul.f32 1.442695, %v1188_v56  ;;  %v1191_v2 = vsub.f32 0.0, %v737_v57  ;;  %v729_v3 = vadd.f32 %v4378_v59, %v728_v63 }
 0x125   :  { %v3703_v4 = vpop.eup %3702  ;;  %3726 = vrcp.f32 %v1566_v61  ;;  %v1564_v5 = vadd.f32 1.0, %v3701_v0  ;;  %v3237_v6 = vpop.f32.mrf.mxu0  ;;  %3332 = vmatmul.mubr.bf16.gmra.mxu0 %v3673_v54 }
 0x126   :  { %v3705_v7 = vpop.eup %3704  ;;  %3728 = vpow2.f32 %v1336_v62  ;;  %v1338_v8 = vmul.f32 1.442695, %v1191_v2  ;;  %v1189_v9 = vsub.f32 0.0, %v729_v3  ;;  %v750_v10 = vadd.f32 %v3237_v6, %v4378_v59  ;;  %3335 = vmatprep.mubr.bf16.mxu0 %v3674_v58  ;;  %v3677_v3 = vld [vmem:[#allocation2 + $0x1f8] sm:$0xff]  }
 0x127   :  { %v3707_v11 = vpop.eup %3706  ;;  %3730 = vrcp.f32 %v1564_v5  ;;  %v1567_v12 = vadd.f32 1.0, %v3705_v7  ;;  %v741_v13 = vpop.f32.mrf.mxu0  ;;  %v1941_v35 = vpack.c.bf16 %v3703_v4, %v3695_v51 }
 0x128   :  { %v3709_v14 = vpop.eup %3708  ;;  %3732 = vpow2.f32 %v1332_v1  ;;  %v1334_v15 = vmul.f32 1.442695, %v1189_v9  ;;  %v1194_v24 = vsub.f32 0.0, %v750_v10  ;;  %v742_v25 = vadd.f32 %v4378_v59, %v741_v13 }
 0x129   :  { %v4402_v26 = vpop.eup %3710  ;;  %3734 = vrcp.f32 %v1567_v12  ;;  %v1565_v32 = vadd.f32 1.0, %v3709_v14  ;;  %v3238_v33 = vpop.f32.mrf.mxu0  ;;  %v1940_v34 = vpack.c.bf16 %v3707_v11, %v3699_v60 }
 0x12a   :  { %v3713_v37 = vpop.eup %3712  ;;  %3736 = vpow2.f32 %v1338_v8  ;;  %v1344_v38 = vmul.f32 1.442695, %v1194_v24  ;;  %v1192_v39 = vsub.f32 0.0, %v742_v25  ;;  %v753_v40 = vadd.f32 %v3238_v33, %v4378_v59 }
 0x12b   :  { %v3715_v42 = vpop.eup %3714  ;;  %3738 = vrcp.f32 %v1565_v32  ;;  %v1570_v43 = vadd.f32 1.0, %v3713_v37  ;;  %3359 = vmatprep.mubr.bf16.mxu1 %v1940_v34  ;;  %v744_v44 = vpop.f32.mrf.mxu0 }
 0x12c   :  { %v3717_v45 = vpop.eup %3716  ;;  %3740 = vpow2.f32 %v1334_v15  ;;  %v1340_v46 = vmul.f32 1.442695, %v1192_v39  ;;  %v1195_v47 = vsub.f32 0.0, %v753_v40  ;;  %v745_v48 = vadd.f32 %v4378_v59, %v744_v44  ;;  %3360 = vmatmul.mubr.bf16.vlgmr.msra.gmra.mxu1 %v1941_v35 }
 0x12d   :  { %v3719_v49 = vpop.eup %3718  ;;  %3742 = vrcp.f32 %v1570_v43  ;;  %v1568_v50 = vadd.f32 1.0, %v3717_v45  ;;  %3376 = vmatpush3.bf16.msra.mxu1 %v4335_v16  ;;  %v3241_v51 = vpop.f32.mrf.mxu0  ;;  %3336 = vmatmul.mubr.bf16.gmra.mxu0 %v3675_v36 }
 0x12e   :  { %v3721_v52 = vpop.eup %3720  ;;  %3744 = vpow2.f32 %v1344_v38  ;;  %v1346_v53 = vmul.f32 1.442695, %v1195_v47  ;;  %v1193_v54 = vsub.f32 0.0, %v745_v48  ;;  %v766_v55 = vadd.f32 %v3241_v51, %v4378_v59  ;;  %3377 = vmatprep.subr.bf16.mxu1 %v4355_v23  ;;  %3339 = vmatprep.mubr.bf16.mxu0 %v3676_v41 }
 0x12f   :  { %v3723_v56 = vpop.eup %3722  ;;  %3746 = vrcp.f32 %v1568_v50  ;;  %v1571_v57 = vadd.f32 1.0, %v3721_v52  ;;  %v757_v58 = vpop.f32.mrf.mxu0  ;;  %v1943_v2 = vpack.c.bf16 %v3719_v49, %v4402_v26 }
 0x130   :  { %v3725_v60 = vpop.eup %3724  ;;  %3748 = vpow2.f32 %v1340_v46  ;;  %v1342_v61 = vmul.f32 1.442695, %v1193_v54  ;;  %v1198_v62 = vsub.f32 0.0, %v766_v55  ;;  %v758_v16 = vadd.f32 %v4378_v59, %v757_v58 }
 0x131   :  { %3750 = vrcp.f32 %v1571_v57  ;;  %v1569_v63 = vadd.f32 1.0, %v3725_v60  ;;  %3378 = vmatpush3.bf16.msra.mxu1 %v4355_v23  ;;  %v3242_v0 = vpop.f32.mrf.mxu0  ;;  %v1942_v1 = vpack.c.bf16 %v3723_v56, %v3715_v42 }
 0x132   :  { %v3727_v4 = vpop.eup %3726  ;;  %3752 = vpow2.f32 %v1346_v53  ;;  %v1352_v5 = vmul.f32 1.442695, %v1198_v62  ;;  %v1196_v6 = vsub.f32 0.0, %v758_v16  ;;  %v769_v7 = vadd.f32 %v3242_v0, %v4378_v59  ;;  %3379 = vmatprep.subr.bf16.mxu1 %v4353_v22 }
 0x133   :  { %v3729_v8 = vpop.eup %3728  ;;  %3754 = vrcp.f32 %v1569_v63  ;;  %3363 = vmatprep.mubr.bf16.mxu1 %v1942_v1  ;;  %v760_v9 = vpop.f32.mrf.mxu0 }
 0x134   :  { %v3731_v10 = vpop.eup %3730  ;;  %v1574_v11 = vadd.f32 1.0, %v3729_v8  ;;  %3756 = vpow2.f32 %v1342_v61  ;;  %v1348_v23 = vmul.f32 1.442695, %v1196_v6  ;;  %v1199_v12 = vsub.f32 0.0, %v769_v7  ;;  %3364 = vmatmul.mubr.bf16.gmra.mxu1 %v1943_v2 }
 0x135   :  { %v3733_v13 = vpop.eup %3732  ;;  %3758 = vpow2.f32 %v1352_v5  ;;  %v761_v14 = vadd.f32 %v4378_v59, %v760_v9  ;;  %3380 = vmatpush3.bf16.msra.mxu1 %v4353_v22  ;;  %v3245_v15 = vpop.f32.mrf.mxu0  ;;  %3340 = vmatmul.mubr.bf16.gmra.mxu0 %v3677_v3 }
 0x136   :  { %v3735_v24 = vpop.eup %3734  ;;  %3760 = vrcp.f32 %v1574_v11  ;;  %v1572_v25 = vadd.f32 1.0, %v3733_v13  ;;  %v1354_v26 = vmul.f32 1.442695, %v1199_v12  ;;  %v782_v32 = vadd.f32 %v3245_v15, %v4378_v59  ;;  %3381 = vmatprep.subr.bf16.mxu1 %v4349_v21 }
 0x137   :  { %v3737_v33 = vpop.eup %3736  ;;  %3762 = vpow2.f32 %v1348_v23  ;;  %v1197_v34 = vsub.f32 0.0, %v761_v14  ;;  %v773_v35 = vpop.f32.mrf.mxu0  ;;  %v1945_v43 = vpack.c.bf16 %v3735_v24, %v3727_v4 }
 0x138   :  { %v3739_v36 = vpop.eup %3738  ;;  %3764 = vrcp.f32 %v1572_v25  ;;  %v1575_v37 = vadd.f32 1.0, %v3737_v33  ;;  %v1202_v38 = vsub.f32 0.0, %v782_v32  ;;  %v774_v22 = vadd.f32 %v4378_v59, %v773_v35 }
 0x139   :  { %v3741_v39 = vpop.eup %3740  ;;  %3766 = vpow2.f32 %v1354_v26  ;;  %v1350_v40 = vmul.f32 1.442695, %v1197_v34  ;;  %3382 = vmatpush3.bf16.msra.mxu1 %v4349_v21  ;;  %v3246_v41 = vpop.f32.mrf.mxu0  ;;  %v1944_v42 = vpack.c.bf16 %v3739_v36, %v3731_v10 }
 0x13a   :  { %v3743_v44 = vpop.eup %3742  ;;  %3768 = vrcp.f32 %v1575_v37  ;;  %v1573_v45 = vadd.f32 1.0, %v3741_v39  ;;  %v1360_v46 = vmul.f32 1.442695, %v1202_v38  ;;  %v1200_v47 = vsub.f32 0.0, %v774_v22  ;;  %3383 = vmatprep.subr.bf16.mxu1 %v4347_v20 }
 0x13b   :  { %v3745_v48 = vpop.eup %3744  ;;  %3770 = vpow2.f32 %v1350_v40  ;;  %v785_v49 = vadd.f32 %v3246_v41, %v4378_v59  ;;  %3367 = vmatprep.mubr.bf16.mxu1 %v1944_v42  ;;  %v776_v50 = vpop.f32.mrf.mxu0 }
 0x13c   :  { %v3747_v51 = vpop.eup %3746  ;;  %3772 = vrcp.f32 %v1573_v45  ;;  %v1578_v52 = vadd.f32 1.0, %v3745_v48  ;;  %v1356_v21 = vmul.f32 1.442695, %v1200_v47  ;;  %v777_v53 = vadd.f32 %v4378_v59, %v776_v50  ;;  %3368 = vmatmul.mubr.bf16.gmra.mxu1 %v1945_v43 }
 0x13d   :  { %v3749_v54 = vpop.eup %3748  ;;  %3774 = vpow2.f32 %v1360_v46  ;;  %v1203_v55 = vsub.f32 0.0, %v785_v49  ;;  %3384 = vmatpush3.bf16.msra.mxu1 %v4347_v20  ;;  %v3249_v56 = vpop.f32.mrf.mxu0 }
 0x13e   :  { %v3751_v57 = vpop.eup %3750  ;;  %3776 = vrcp.f32 %v1578_v52  ;;  %v1201_v58 = vsub.f32 0.0, %v777_v53  ;;  %v798_v60 = vadd.f32 %v3249_v56, %v4378_v59  ;;  %3385 = vmatprep.subr.bf16.mxu1 %v4343_v19  ;;  %v1576_v0 = vadd.f32 1.0, %v3749_v54 }
 0x13f   :  { %v3753_v61 = vpop.eup %3752  ;;  %3778 = vpow2.f32 %v1356_v21  ;;  %v1362_v62 = vmul.f32 1.442695, %v1203_v55  ;;  %v789_v16 = vpop.f32.mrf.mxu0  ;;  %v1947_v7 = vpack.c.bf16 %v3751_v57, %v3743_v44 }
 0x140   :  { %v3755_v63 = vpop.eup %3754  ;;  %v1579_v1 = vadd.f32 1.0, %v3753_v61  ;;  %v1358_v2 = vmul.f32 1.442695, %v1201_v58  ;;  %v1206_v3 = vsub.f32 0.0, %v798_v60  ;;  %v790_v20 = vadd.f32 %v4378_v59, %v789_v16 }
 0x141   :  { %v3757_v4 = vpop.eup %3756  ;;  %3780 = vpow2.f32 %v1362_v62  ;;  %3386 = vmatpush3.bf16.msra.mxu1 %v4343_v19  ;;  %v3250_v5 = vpop.f32.mrf.mxu0  ;;  %v1946_v6 = vpack.c.bf16 %v3755_v63, %v3747_v51 }
 0x142   :  { %v3759_v8 = vpop.eup %3758  ;;  %3782 = vrcp.f32 %v1579_v1  ;;  %v1577_v9 = vadd.f32 1.0, %v3757_v4  ;;  %v1368_v10 = vmul.f32 1.442695, %v1206_v3  ;;  %v801_v11 = vadd.f32 %v3250_v5, %v4378_v59  ;;  %3387 = vmatprep.subr.bf16.mxu1 %v4341_v18 }
 0x143   :  { %v3761_v23 = vpop.eup %3760  ;;  %3784 = vpow2.f32 %v1358_v2  ;;  %v1204_v12 = vsub.f32 0.0, %v790_v20  ;;  %3371 = vmatprep.mubr.bf16.mxu1 %v1946_v6  ;;  %v792_v13 = vpop.f32.mrf.mxu0  ;;  %v1582_v43 = vadd.f32 1.0, %v3759_v8 }
 0x144   :  { %v3763_v14 = vpop.eup %3762  ;;  %3786 = vrcp.f32 %v1577_v9  ;;  %v1207_v15 = vsub.f32 0.0, %v801_v11  ;;  %v793_v19 = vadd.f32 %v4378_v59, %v792_v13  ;;  %3372 = vmatmul.mubr.bf16.gmra.mxu1 %v1947_v7 }
 0x145   :  { %v3765_v24 = vpop.eup %3764  ;;  %3788 = vrcp.f32 %v1576_v0  ;;  %v1580_v25 = vadd.f32 1.0, %v3763_v14  ;;  %v1364_v26 = vmul.f32 1.442695, %v1204_v12  ;;  %3388 = vmatpush3.bf16.msra.mxu1 %v4341_v18  ;;  %v3253_v32 = vpop.f32.mrf.mxu0 }
 0x146   :  { %v3767_v33 = vpop.eup %3766  ;;  %3790 = vpow2.f32 %v1368_v10  ;;  %v1370_v34 = vmul.f32 1.442695, %v1207_v15  ;;  %v1205_v35 = vsub.f32 0.0, %v793_v19  ;;  %v814_v36 = vadd.f32 %v3253_v32, %v4378_v59  ;;  %3389 = vmatprep.subr.bf16.mxu1 %v4338_v17 }
 0x147   :  { %v3769_v37 = vpop.eup %3768  ;;  %3792 = vrcp.f32 %v1580_v25  ;;  %v1583_v38 = vadd.f32 1.0, %v3767_v33  ;;  %v805_v22 = vpop.f32.mrf.mxu0 }
 0x148   :  { %v3771_v39 = vpop.eup %3770  ;;  %3794 = vpow2.f32 %v1364_v26  ;;  %v1366_v40 = vmul.f32 1.442695, %v1205_v35  ;;  %v1210_v41 = vsub.f32 0.0, %v814_v36  ;;  %v806_v42 = vadd.f32 %v4378_v59, %v805_v22 }
 0x149   :  { %v3773_v18 = vpop.eup %3772  ;;  %3796 = vrcp.f32 %v1583_v38  ;;  %v1581_v44 = vadd.f32 1.0, %v3771_v39  ;;  %3390 = vmatpush3.bf16.msra.mxu1 %v4338_v17  ;;  %v3254_v45 = vpop.f32.mrf.mxu0  ;;  %v1949_v21 = vpack.c.bf16 %v3769_v37, %v3761_v23 }
 0x14a   :  { %v3775_v46 = vpop.eup %3774  ;;  %3798 = vpow2.f32 %v1370_v34  ;;  %v1376_v47 = vmul.f32 1.442695, %v1210_v41  ;;  %v1208_v48 = vsub.f32 0.0, %v806_v42  ;;  %v817_v49 = vadd.f32 %v3254_v45, %v4378_v59  ;;  %3407 = vmatprep.subr.bf16.mxu1 %v4372_v31 }
 0x14b   :  { %v3777_v50 = vpop.eup %3776  ;;  %3800 = vrcp.f32 %v1581_v44  ;;  %v1948_v51 = vpack.c.bf16 %v3773_v18, %v3765_v24  ;;  %v808_v52 = vpop.f32.mrf.mxu0  ;;  %v1586_v5 = vadd.f32 1.0, %v3775_v46 }
 0x14c   :  { %v3779_v53 = vpop.eup %3778  ;;  %3802 = vpow2.f32 %v1366_v40  ;;  %v1372_v54 = vmul.f32 1.442695, %v1208_v48  ;;  %v1211_v55 = vsub.f32 0.0, %v817_v49  ;;  %v809_v17 = vadd.f32 %v4378_v59, %v808_v52 }
 0x14d   :  { %3804 = vrcp.f32 %v1582_v43  ;;  %v1584_v56 = vadd.f32 1.0, %v3779_v53  ;;  %3391 = vmatprep.mubr.bf16.mxu1 %v1948_v51  ;;  %v3257_v57 = vpop.f32.mrf.mxu0 }
 0x14e   :  { %v3781_v58 = vpop.eup %3780  ;;  %3806 = vpow2.f32 %v1376_v47  ;;  %v1378_v60 = vmul.f32 1.442695, %v1211_v55  ;;  %v1209_v61 = vsub.f32 0.0, %v809_v17  ;;  %3392 = vmatmul.mubr.bf16.vlgmr.msra.gmra.mxu1 %v1949_v21  ;;  %v830_v62 = vadd.f32 %v3257_v57, %v4378_v59 }
 0x14f   :  { %v3783_v16 = vpop.eup %3782  ;;  %3808 = vrcp.f32 %v1584_v56  ;;  %v1587_v63 = vadd.f32 1.0, %v3781_v58  ;;  %3408 = vmatpush3.bf16.msra.mxu1 %v4372_v31  ;;  %v821_v0 = vpop.f32.mrf.mxu0 }
 0x150   :  { %v3785_v1 = vpop.eup %3784  ;;  %3810 = vpow2.f32 %v1372_v54  ;;  %v1374_v2 = vmul.f32 1.442695, %v1209_v61  ;;  %v1214_v3 = vsub.f32 0.0, %v830_v62  ;;  %3409 = vmatprep.subr.bf16.mxu1 %v4368_v30  ;;  %v822_v4 = vadd.f32 %v4378_v59, %v821_v0  ;;  %v4190_v62 = vld [vmem:[#allocation2 + $0x98] sm:$0xff]  }
 0x151   :  { %v3787_v20 = vpop.eup %3786  ;;  %3812 = vrcp.f32 %v1587_v63  ;;  %v1585_v6 = vadd.f32 1.0, %v3785_v1  ;;  %v3258_v7 = vpop.f32.mrf.mxu0  ;;  %v1951_v13 = vpack.c.bf16 %v3783_v16, %v3777_v50 }
 0x152   :  { %v3789_v8 = vpop.eup %3788  ;;  %3814 = vpow2.f32 %v1378_v60  ;;  %v1384_v9 = vmul.f32 1.442695, %v1214_v3  ;;  %v1212_v10 = vsub.f32 0.0, %v822_v4  ;;  %v833_v31 = vadd.f32 %v3258_v7, %v4378_v59 }
 0x153   :  { %v3791_v11 = vpop.eup %3790  ;;  %3816 = vrcp.f32 %v1585_v6  ;;  %3410 = vmatpush3.bf16.msra.mxu1 %v4368_v30  ;;  %v1950_v23 = vpack.c.bf16 %v3787_v20, %v3789_v8  ;;  %v824_v12 = vpop.f32.mrf.mxu0 }
 0x154   :  { %v3793_v14 = vpop.eup %3792  ;;  %v1590_v15 = vadd.f32 1.0, %v3791_v11  ;;  %3818 = vpow2.f32 %v1374_v2  ;;  %v1380_v19 = vmul.f32 1.442695, %v1212_v10  ;;  %v1215_v24 = vsub.f32 0.0, %v833_v31  ;;  %3411 = vmatprep.subr.bf16.mxu1 %v4366_v29  ;;  %v4191_v2 = vld [vmem:[#allocation2 + $0x90] sm:$0xff]  }
 0x155   :  { %v3795_v25 = vpop.eup %3794  ;;  %3820 = vrcp.f32 %v1586_v5  ;;  %3395 = vmatprep.mubr.bf16.mxu1 %v1950_v23  ;;  %v825_v26 = vadd.f32 %v4378_v59, %v824_v12  ;;  %v3261_v32 = vpop.f32.mrf.mxu0 }
 0x156   :  { %v3797_v33 = vpop.eup %3796  ;;  %3822 = vpow2.f32 %v1384_v9  ;;  %v1386_v34 = vmul.f32 1.442695, %v1215_v24  ;;  %3396 = vmatmul.mubr.bf16.gmra.mxu1 %v1951_v13  ;;  %v846_v30 = vadd.f32 %v3261_v32, %v4378_v59  ;;  %v1588_v42 = vadd.f32 1.0, %v3795_v25 }
 0x157   :  { %v3799_v35 = vpop.eup %3798  ;;  %3824 = vpow2.f32 %v1380_v19  ;;  %v1213_v36 = vsub.f32 0.0, %v825_v26  ;;  %3412 = vmatpush3.bf16.msra.mxu1 %v4366_v29  ;;  %v837_v37 = vpop.f32.mrf.mxu0 }
 0x158   :  { %v3801_v38 = vpop.eup %3800  ;;  %3826 = vrcp.f32 %v1590_v15  ;;  %v1591_v22 = vadd.f32 1.0, %v3799_v35  ;;  %v1218_v39 = vsub.f32 0.0, %v846_v30  ;;  %3413 = vmatprep.subr.bf16.mxu1 %v4362_v28  ;;  %v838_v40 = vadd.f32 %v4378_v59, %v837_v37 }
 0x159   :  { %v3803_v41 = vpop.eup %3802  ;;  %3828 = vpow2.f32 %v1386_v34  ;;  %v1382_v18 = vmul.f32 1.442695, %v1213_v36  ;;  %v3262_v43 = vpop.f32.mrf.mxu0  ;;  %v1952_v44 = vpack.c.bf16 %v3801_v38, %v3793_v14  ;;  %v4192_v14 = vld [vmem:[#allocation2 + $0x88] sm:$0xff]  }
 0x15a   :  { %v3805_v45 = vpop.eup %3804  ;;  %3830 = vrcp.f32 %v1591_v22  ;;  %v1589_v46 = vadd.f32 1.0, %v3803_v41  ;;  %v1392_v47 = vmul.f32 1.442695, %v1218_v39  ;;  %v1216_v29 = vsub.f32 0.0, %v838_v40  ;;  %v4193_v41 = vld [vmem:[#allocation2 + $0x80] sm:$0xff]  }
 0x15b   :  { %v3807_v48 = vpop.eup %3806  ;;  %3832 = vpow2.f32 %v1382_v18  ;;  %3414 = vmatpush3.bf16.msra.mxu1 %v4362_v28  ;;  %v849_v49 = vadd.f32 %v3262_v43, %v4378_v59  ;;  %3399 = vmatprep.mubr.bf16.mxu1 %v1952_v44  ;;  %v840_v50 = vpop.f32.mrf.mxu0  ;;  %v1953_v51 = vpack.c.bf16 %v3797_v33, %v3805_v45 }
 0x15c   :  { %v3809_v52 = vpop.eup %3808  ;;  %3834 = vrcp.f32 %v1589_v46  ;;  %v1594_v21 = vadd.f32 1.0, %v3807_v48  ;;  %v1388_v53 = vmul.f32 1.442695, %v1216_v29  ;;  %3415 = vmatprep.subr.bf16.mxu1 %v4360_v27  ;;  %v841_v54 = vadd.f32 %v4378_v59, %v840_v50 }
 0x15d   :  { %v3811_v55 = vpop.eup %3810  ;;  %3836 = vrcp.f32 %v1588_v42  ;;  %v1219_v17 = vsub.f32 0.0, %v849_v49  ;;  %v3265_v56 = vpop.f32.mrf.mxu0  ;;  %v4463_v42 = vld [vmem:[%s4553_s2] ss:$0 sm:$0xff] }
 0x15e   :  { %v3813_v57 = vpop.eup %3812  ;;  %3838 = vpow2.f32 %v1392_v47  ;;  %v1217_v28 = vsub.f32 0.0, %v841_v54  ;;  %3400 = vmatmul.mubr.bf16.gmra.mxu1 %v1953_v51  ;;  %v862_v58 = vadd.f32 %v3265_v56, %v4378_v59  ;;  %v1592_v4 = vadd.f32 1.0, %v3811_v55  ;;  %v4195_v55 = vld [vmem:[#allocation2 + $0xf8] sm:$0xff]  }
 0x15f   :  { %v3815_v60 = vpop.eup %3814  ;;  %3840 = vpow2.f32 %v1388_v53  ;;  %v1394_v61 = vmul.f32 1.442695, %v1219_v17  ;;  %3416 = vmatpush3.bf16.msra.mxu1 %v4190_v62  ;;  %v853_v16 = vpop.f32.mrf.mxu0 }
 0x160   :  { %v3817_v63 = vpop.eup %3816  ;;  %3842 = vrcp.f32 %v1594_v21  ;;  %v1595_v27 = vadd.f32 1.0, %v3815_v60  ;;  %v1390_v0 = vmul.f32 1.442695, %v1217_v28  ;;  %v1222_v1 = vsub.f32 0.0, %v862_v58  ;;  %3417 = vmatprep.subr.bf16.mxu1 %v4191_v2 }
 0x161   :  { %v3819_v3 = vpop.eup %3818  ;;  %3844 = vpow2.f32 %v1394_v61  ;;  %v854_v20 = vadd.f32 %v4378_v59, %v853_v16  ;;  %v3266_v5 = vpop.f32.mrf.mxu0  ;;  %v1954_v6 = vpack.c.bf16 %v3817_v63, %v3809_v52 }
 0x162   :  { %v3821_v7 = vpop.eup %3820  ;;  %3846 = vrcp.f32 %v1595_v27  ;;  %v1593_v8 = vadd.f32 1.0, %v3819_v3  ;;  %v1400_v9 = vmul.f32 1.442695, %v1222_v1  ;;  %v865_v10 = vadd.f32 %v3266_v5, %v4378_v59  ;;  %v4196_v3 = vld [vmem:[#allocation2 + $0xf0] sm:$0xff]  }
 0x163   :  { %v3823_v31 = vpop.eup %3822  ;;  %3848 = vpow2.f32 %v1390_v0  ;;  %v1220_v11 = vsub.f32 0.0, %v854_v20  ;;  %3418 = vmatpush3.bf16.msra.mxu1 %v4191_v2  ;;  %3403 = vmatprep.mubr.bf16.mxu1 %v1954_v6  ;;  %v856_v23 = vpop.f32.mrf.mxu0  ;;  %v1955_v19 = vpack.c.bf16 %v3813_v57, %v3821_v7 }
 0x164   :  { %v3825_v12 = vpop.eup %3824  ;;  %3850 = vrcp.f32 %v1593_v8  ;;  %v1223_v13 = vsub.f32 0.0, %v865_v10  ;;  %3419 = vmatprep.subr.bf16.mxu1 %v4192_v14  ;;  %v857_v15 = vadd.f32 %v4378_v59, %v856_v23 }
 0x165   :  { %v3827_v24 = vpop.eup %3826  ;;  %3852 = vrcp.f32 %v1592_v4  ;;  %v1596_v25 = vadd.f32 1.0, %v3825_v12  ;;  %v1396_v26 = vmul.f32 1.442695, %v1220_v11  ;;  %v3269_v32 = vpop.f32.mrf.mxu0 }
 0x166   :  { %v3829_v33 = vpop.eup %3828  ;;  %3854 = vpow2.f32 %v1400_v9  ;;  %v1402_v34 = vmul.f32 1.442695, %v1223_v13  ;;  %v1221_v30 = vsub.f32 0.0, %v857_v15  ;;  %3404 = vmatmul.mubr.bf16.gmra.mxu1 %v1955_v19  ;;  %v878_v35 = vadd.f32 %v3269_v32, %v4378_v59 }
 0x167   :  { %v3831_v36 = vpop.eup %3830  ;;  %3856 = vrcp.f32 %v1596_v25  ;;  %v1599_v37 = vadd.f32 1.0, %v3829_v33  ;;  %3420 = vmatpush3.bf16.msra.mxu1 %v4192_v14  ;;  %v869_v38 = vpop.f32.mrf.mxu0  ;;  %v1598_v59 = vadd.f32 1.0, %v3823_v31  ;;  %v4197_v25 = vld [vmem:[#allocation2 + $0xe8] sm:$0xff]  }
 0x168   :  { %v3833_v22 = vpop.eup %3832  ;;  %3858 = vpow2.f32 %v1396_v26  ;;  %v1398_v39 = vmul.f32 1.442695, %v1221_v30  ;;  %v1226_v40 = vsub.f32 0.0, %v878_v35  ;;  %3421 = vmatprep.subr.bf16.mxu1 %v4193_v41  ;;  %v870_v18 = vadd.f32 %v4463_v42, %v869_v38 }
 0x169   :  { %v3835_v43 = vpop.eup %3834  ;;  %3860 = vrcp.f32 %v1599_v37  ;;  %v1597_v44 = vadd.f32 1.0, %v3833_v22  ;;  %v3270_v45 = vpop.f32.mrf.mxu0  ;;  %v1957_v52 = vpack.c.bf16 %v3831_v36, %v3827_v24 }
 0x16a   :  { %v3837_v46 = vpop.eup %3836  ;;  %3862 = vpow2.f32 %v1402_v34  ;;  %v1408_v47 = vmul.f32 1.442695, %v1226_v40  ;;  %v1224_v29 = vsub.f32 0.0, %v870_v18  ;;  %v881_v48 = vadd.f32 %v4463_v42, %v3270_v45 }
 0x16b   :  { %v3839_v49 = vpop.eup %3838  ;;  %3864 = vrcp.f32 %v1597_v44  ;;  %3422 = vmatpush3.bf16.msra.mxu1 %v4193_v41  ;;  %v1956_v50 = vpack.c.bf16 %v3835_v43, %v3837_v46  ;;  %v872_v51 = vpop.f32.mrf.mxu0  ;;  %v4198_v41 = vld [vmem:[#allocation2 + $0xe0] sm:$0xff]  }
 0x16c   :  { %v3841_v21 = vpop.eup %3840  ;;  %3866 = vpow2.f32 %v1398_v39  ;;  %v1404_v53 = vmul.f32 1.442695, %v1224_v29  ;;  %v1227_v54 = vsub.f32 0.0, %v881_v48  ;;  %3439 = vmatprep.subr.bf16.mxu1 %v4195_v55  ;;  %v873_v17 = vadd.f32 %v4463_v42, %v872_v51 }
 0x16d   :  { %v3843_v56 = vpop.eup %3842  ;;  %3868 = vrcp.f32 %v1598_v59  ;;  %v1600_v57 = vadd.f32 1.0, %v3841_v21  ;;  %3423 = vmatprep.mubr.bf16.mxu1 %v1956_v50  ;;  %v3273_v28 = vpop.f32.mrf.mxu0  ;;  %v1602_v5 = vadd.f32 1.0, %v3839_v49 }
 0x16e   :  { %v3845_v58 = vpop.eup %3844  ;;  %3870 = vpow2.f32 %v1408_v47  ;;  %v1410_v60 = vmul.f32 1.442695, %v1227_v54  ;;  %v1225_v61 = vsub.f32 0.0, %v873_v17  ;;  %3424 = vmatmul.mubr.bf16.vlgmr.msra.gmra.mxu1 %v1957_v52  ;;  %v894_v62 = vadd.f32 %v4463_v42, %v3273_v28  ;;  %v4199_v17 = vld [vmem:[#allocation2 + $0xd8] sm:$0xff]  }
 0x16f   :  { %v3847_v16 = vpop.eup %3846  ;;  %3872 = vrcp.f32 %v1600_v57  ;;  %v1603_v63 = vadd.f32 1.0, %v3845_v58  ;;  %3440 = vmatpush3.bf16.msra.mxu1 %v4195_v55  ;;  %v885_v27 = vpop.f32.mrf.mxu0 }
 0x170   :  { %v3849_v0 = vpop.eup %3848  ;;  %3874 = vpow2.f32 %v1404_v53  ;;  %v1406_v1 = vmul.f32 1.442695, %v1225_v61  ;;  %v1230_v2 = vsub.f32 0.0, %v894_v62  ;;  %3441 = vmatprep.subr.bf16.mxu1 %v4196_v3  ;;  %v886_v4 = vadd.f32 %v4463_v42, %v885_v27 }
 0x171   :  { %v3851_v20 = vpop.eup %3850  ;;  %3876 = vrcp.f32 %v1603_v63  ;;  %v1601_v6 = vadd.f32 1.0, %v3849_v0  ;;  %v3274_v7 = vpop.f32.mrf.mxu0  ;;  %v1959_v13 = vpack.c.bf16 %v3847_v16, %v3843_v56 }
 0x172   :  { %v3853_v8 = vpop.eup %3852  ;;  %3878 = vpow2.f32 %v1410_v60  ;;  %v1416_v9 = vmul.f32 1.442695, %v1230_v2  ;;  %v1228_v10 = vsub.f32 0.0, %v886_v4  ;;  %v897_v31 = vadd.f32 %v4463_v42, %v3274_v7  ;;  %v4200_v4 = vld [vmem:[#allocation2 + $0xd0] sm:$0xff]  }
 0x173   :  { %v3855_v11 = vpop.eup %3854  ;;  %3880 = vrcp.f32 %v1601_v6  ;;  %3442 = vmatpush3.bf16.msra.mxu1 %v4196_v3  ;;  %v1958_v23 = vpack.c.bf16 %v3851_v20, %v3853_v8  ;;  %v888_v12 = vpop.f32.mrf.mxu0 }
 0x174   :  { %v3857_v14 = vpop.eup %3856  ;;  %v1606_v15 = vadd.f32 1.0, %v3855_v11  ;;  %3882 = vpow2.f32 %v1406_v1  ;;  %v1412_v19 = vmul.f32 1.442695, %v1228_v10  ;;  %v1231_v24 = vsub.f32 0.0, %v897_v31  ;;  %3443 = vmatprep.subr.bf16.mxu1 %v4197_v25 }
 0x175   :  { %v3859_v26 = vpop.eup %3858  ;;  %3884 = vrcp.f32 %v1602_v5  ;;  %3427 = vmatprep.mubr.bf16.mxu1 %v1958_v23  ;;  %v889_v32 = vadd.f32 %v4463_v42, %v888_v12  ;;  %v3277_v33 = vpop.f32.mrf.mxu0 }
 0x176   :  { %v3861_v34 = vpop.eup %3860  ;;  %3886 = vpow2.f32 %v1416_v9  ;;  %v1418_v30 = vmul.f32 1.442695, %v1231_v24  ;;  %3428 = vmatmul.mubr.bf16.gmra.mxu1 %v1959_v13  ;;  %v910_v35 = vadd.f32 %v4463_v42, %v3277_v33  ;;  %v1604_v59 = vadd.f32 1.0, %v3859_v26 }
 0x177   :  { %v3863_v36 = vpop.eup %3862  ;;  %3888 = vpow2.f32 %v1412_v19  ;;  %v1229_v37 = vsub.f32 0.0, %v889_v32  ;;  %3444 = vmatpush3.bf16.msra.mxu1 %v4197_v25  ;;  %v901_v38 = vpop.f32.mrf.mxu0  ;;  %v4201_v19 = vld [vmem:[#allocation2 + $0xc8] sm:$0xff]  }
 0x178   :  { %v3865_v22 = vpop.eup %3864  ;;  %3890 = vrcp.f32 %v1606_v15  ;;  %v1607_v39 = vadd.f32 1.0, %v3863_v36  ;;  %v1234_v40 = vsub.f32 0.0, %v910_v35  ;;  %3445 = vmatprep.subr.bf16.mxu1 %v4198_v41  ;;  %v902_v18 = vadd.f32 %v4463_v42, %v901_v38 }
 0x179   :  { %v3867_v43 = vpop.eup %3866  ;;  %3892 = vpow2.f32 %v1418_v30  ;;  %v1414_v44 = vmul.f32 1.442695, %v1229_v37  ;;  %v3278_v45 = vpop.f32.mrf.mxu0  ;;  %v1960_v46 = vpack.c.bf16 %v3865_v22, %v3857_v14 }
 0x17a   :  { %v3869_v47 = vpop.eup %3868  ;;  %3894 = vrcp.f32 %v1607_v39  ;;  %v1605_v29 = vadd.f32 1.0, %v3867_v43  ;;  %v1424_v48 = vmul.f32 1.442695, %v1234_v40  ;;  %v1232_v49 = vsub.f32 0.0, %v902_v18  ;;  %v4202_v43 = vld [vmem:[#allocation2 + $0xc0] sm:$0xff]  }
 0x17b   :  { %v3871_v50 = vpop.eup %3870  ;;  %3896 = vpow2.f32 %v1414_v44  ;;  %3446 = vmatpush3.bf16.msra.mxu1 %v4198_v41  ;;  %v913_v51 = vadd.f32 %v4463_v42, %v3278_v45  ;;  %3431 = vmatprep.mubr.bf16.mxu1 %v1960_v46  ;;  %v904_v52 = vpop.f32.mrf.mxu0  ;;  %v1961_v21 = vpack.c.bf16 %v3861_v34, %v3869_v47 }
 0x17c   :  { %v3873_v53 = vpop.eup %3872  ;;  %3898 = vrcp.f32 %v1605_v29  ;;  %v1610_v54 = vadd.f32 1.0, %v3871_v50  ;;  %v1420_v55 = vmul.f32 1.442695, %v1232_v49  ;;  %3447 = vmatprep.subr.bf16.mxu1 %v4199_v17  ;;  %v905_v56 = vadd.f32 %v4463_v42, %v904_v52 }
 0x17d   :  { %v3875_v57 = vpop.eup %3874  ;;  %3900 = vrcp.f32 %v1604_v59  ;;  %v1235_v28 = vsub.f32 0.0, %v913_v51  ;;  %v3281_v58 = vpop.f32.mrf.mxu0 }
 0x17e   :  { %v3877_v60 = vpop.eup %3876  ;;  %3902 = vpow2.f32 %v1424_v48  ;;  %v1233_v61 = vsub.f32 0.0, %v905_v56  ;;  %3432 = vmatmul.mubr.bf16.gmra.mxu1 %v1961_v21  ;;  %v926_v62 = vadd.f32 %v4463_v42, %v3281_v58  ;;  %v1608_v5 = vadd.f32 1.0, %v3875_v57  ;;  %v4203_v56 = vld [vmem:[#allocation2 + $0x138] sm:$0xff]  }
 0x17f   :  { %v3879_v16 = vpop.eup %3878  ;;  %3904 = vpow2.f32 %v1420_v55  ;;  %v1426_v63 = vmul.f32 1.442695, %v1235_v28  ;;  %3448 = vmatpush3.bf16.msra.mxu1 %v4199_v17  ;;  %v917_v27 = vpop.f32.mrf.mxu0 }
 0x180   :  { %v3881_v0 = vpop.eup %3880  ;;  %3906 = vrcp.f32 %v1610_v54  ;;  %v1611_v1 = vadd.f32 1.0, %v3879_v16  ;;  %v1422_v2 = vmul.f32 1.442695, %v1233_v61  ;;  %v1238_v3 = vsub.f32 0.0, %v926_v62  ;;  %3449 = vmatprep.subr.bf16.mxu1 %v4200_v4 }
 0x181   :  { %v3883_v20 = vpop.eup %3882  ;;  %3908 = vpow2.f32 %v1426_v63  ;;  %v918_v6 = vadd.f32 %v4463_v42, %v917_v27  ;;  %v3282_v7 = vpop.f32.mrf.mxu0  ;;  %v1962_v8 = vpack.c.bf16 %v3881_v0, %v3873_v53 }
 0x182   :  { %v3885_v9 = vpop.eup %3884  ;;  %3910 = vrcp.f32 %v1611_v1  ;;  %v1609_v10 = vadd.f32 1.0, %v3883_v20  ;;  %v1432_v31 = vmul.f32 1.442695, %v1238_v3  ;;  %v929_v11 = vadd.f32 %v4463_v42, %v3282_v7  ;;  %v4204_v20 = vld [vmem:[#allocation2 + $0x130] sm:$0xff]  }
 0x183   :  { %v3887_v23 = vpop.eup %3886  ;;  %3912 = vpow2.f32 %v1422_v2  ;;  %v1236_v12 = vsub.f32 0.0, %v918_v6  ;;  %3450 = vmatpush3.bf16.msra.mxu1 %v4200_v4  ;;  %3435 = vmatprep.mubr.bf16.mxu1 %v1962_v8  ;;  %v920_v13 = vpop.f32.mrf.mxu0  ;;  %v1963_v25 = vpack.c.bf16 %v3877_v60, %v3885_v9 }
 0x184   :  { %v3889_v14 = vpop.eup %3888  ;;  %3914 = vrcp.f32 %v1609_v10  ;;  %v1239_v15 = vsub.f32 0.0, %v929_v11  ;;  %3451 = vmatprep.subr.bf16.mxu1 %v4201_v19  ;;  %v921_v24 = vadd.f32 %v4463_v42, %v920_v13  ;;  %v1614_v45 = vadd.f32 1.0, %v3887_v23 }
 0x185   :  { %v3891_v26 = vpop.eup %3890  ;;  %3916 = vrcp.f32 %v1608_v5  ;;  %v1612_v32 = vadd.f32 1.0, %v3889_v14  ;;  %v1428_v33 = vmul.f32 1.442695, %v1236_v12  ;;  %v3285_v34 = vpop.f32.mrf.mxu0 }
 0x186   :  { %v3893_v30 = vpop.eup %3892  ;;  %3918 = vpow2.f32 %v1432_v31  ;;  %v1434_v35 = vmul.f32 1.442695, %v1239_v15  ;;  %v1237_v36 = vsub.f32 0.0, %v921_v24  ;;  %3436 = vmatmul.mubr.bf16.gmra.mxu1 %v1963_v25  ;;  %v942_v37 = vadd.f32 %v4463_v42, %v3285_v34 }
 0x187   :  { %v3895_v38 = vpop.eup %3894  ;;  %3920 = vrcp.f32 %v1612_v32  ;;  %v1615_v22 = vadd.f32 1.0, %v3893_v30  ;;  %3452 = vmatpush3.bf16.msra.mxu1 %v4201_v19  ;;  %v933_v39 = vpop.f32.mrf.mxu0  ;;  %v4205_v32 = vld [vmem:[#allocation2 + $0x128] sm:$0xff]  }
 0x188   :  { %v3897_v40 = vpop.eup %3896  ;;  %3922 = vpow2.f32 %v1428_v33  ;;  %v1430_v41 = vmul.f32 1.442695, %v1237_v36  ;;  %v1242_v18 = vsub.f32 0.0, %v942_v37  ;;  %3453 = vmatprep.subr.bf16.mxu1 %v4202_v43  ;;  %v934_v59 = vadd.f32 %v4463_v42, %v933_v39 }
 0x189   :  { %v3899_v44 = vpop.eup %3898  ;;  %3924 = vrcp.f32 %v1615_v22  ;;  %v1613_v46 = vadd.f32 1.0, %v3897_v40  ;;  %v3286_v47 = vpop.f32.mrf.mxu0  ;;  %v1965_v53 = vpack.c.bf16 %v3895_v38, %v3891_v26 }
 0x18a   :  { %v3901_v29 = vpop.eup %3900  ;;  %3926 = vpow2.f32 %v1434_v35  ;;  %v1440_v48 = vmul.f32 1.442695, %v1242_v18  ;;  %v1240_v49 = vsub.f32 0.0, %v934_v59  ;;  %v945_v50 = vadd.f32 %v4463_v42, %v3286_v47 }
 0x18b   :  { %v3903_v51 = vpop.eup %3902  ;;  %3928 = vrcp.f32 %v1613_v46  ;;  %3454 = vmatpush3.bf16.msra.mxu1 %v4202_v43  ;;  %v1964_v52 = vpack.c.bf16 %v3899_v44, %v3901_v29  ;;  %v936_v21 = vpop.f32.mrf.mxu0  ;;  %v4206_v43 = vld [vmem:[#allocation2 + $0x120] sm:$0xff]  }
 0x18c   :  { %v3905_v54 = vpop.eup %3904  ;;  %3930 = vpow2.f32 %v1430_v41  ;;  %v1436_v55 = vmul.f32 1.442695, %v1240_v49  ;;  %v1243_v17 = vsub.f32 0.0, %v945_v50  ;;  %3471 = vmatprep.subr.bf16.mxu1 %v4203_v56  ;;  %v937_v57 = vadd.f32 %v4463_v42, %v936_v21 }
 0x18d   :  { %v3907_v28 = vpop.eup %3906  ;;  %3932 = vrcp.f32 %v1614_v45  ;;  %v1616_v58 = vadd.f32 1.0, %v3905_v54  ;;  %3455 = vmatprep.mubr.bf16.mxu1 %v1964_v52  ;;  %v3289_v60 = vpop.f32.mrf.mxu0  ;;  %v1618_v7 = vadd.f32 1.0, %v3903_v51 }
 0x18e   :  { %v3909_v61 = vpop.eup %3908  ;;  %3934 = vpow2.f32 %v1440_v48  ;;  %v1442_v62 = vmul.f32 1.442695, %v1243_v17  ;;  %v1241_v16 = vsub.f32 0.0, %v937_v57  ;;  %3456 = vmatmul.mubr.bf16.vlgmr.msra.gmra.mxu1 %v1965_v53  ;;  %v958_v63 = vadd.f32 %v4463_v42, %v3289_v60  ;;  %v4207_v57 = vld [vmem:[#allocation2 + $0x118] sm:$0xff]  }
 0x18f   :  { %v3911_v27 = vpop.eup %3910  ;;  %3936 = vrcp.f32 %v1616_v58  ;;  %v1619_v0 = vadd.f32 1.0, %v3909_v61  ;;  %3472 = vmatpush3.bf16.msra.mxu1 %v4203_v56  ;;  %v949_v1 = vpop.f32.mrf.mxu0 }
 0x190   :  { %v3913_v2 = vpop.eup %3912  ;;  %3938 = vpow2.f32 %v1436_v55  ;;  %v1438_v3 = vmul.f32 1.442695, %v1241_v16  ;;  %v1246_v4 = vsub.f32 0.0, %v958_v63  ;;  %3473 = vmatprep.subr.bf16.mxu1 %v4204_v20  ;;  %v950_v5 = vadd.f32 %v4463_v42, %v949_v1 }
 0x191   :  { %v3915_v6 = vpop.eup %3914  ;;  %3940 = vrcp.f32 %v1619_v0  ;;  %v1617_v8 = vadd.f32 1.0, %v3913_v2  ;;  %v3290_v9 = vpop.f32.mrf.mxu0  ;;  %v1967_v15 = vpack.c.bf16 %v3911_v27, %v3907_v28 }
 0x192   :  { %v3917_v10 = vpop.eup %3916  ;;  %3942 = vpow2.f32 %v1442_v62  ;;  %v1448_v31 = vmul.f32 1.442695, %v1246_v4  ;;  %v1244_v11 = vsub.f32 0.0, %v950_v5  ;;  %v961_v23 = vadd.f32 %v4463_v42, %v3290_v9  ;;  %v4208_v5 = vld [vmem:[#allocation2 + $0x110] sm:$0xff]  }
 0x193   :  { %v3919_v12 = vpop.eup %3918  ;;  %3944 = vrcp.f32 %v1617_v8  ;;  %3474 = vmatpush3.bf16.msra.mxu1 %v4204_v20  ;;  %v1966_v13 = vpack.c.bf16 %v3915_v6, %v3917_v10  ;;  %v952_v14 = vpop.f32.mrf.mxu0 }
 0x194   :  { %v3921_v19 = vpop.eup %3920  ;;  %v1622_v24 = vadd.f32 1.0, %v3919_v12  ;;  %3946 = vpow2.f32 %v1438_v3  ;;  %v1444_v25 = vmul.f32 1.442695, %v1244_v11  ;;  %v1247_v26 = vsub.f32 0.0, %v961_v23  ;;  %3475 = vmatprep.subr.bf16.mxu1 %v4205_v32 }
 0x195   :  { %v3923_v33 = vpop.eup %3922  ;;  %3948 = vrcp.f32 %v1618_v7  ;;  %3459 = vmatprep.mubr.bf16.mxu1 %v1966_v13  ;;  %v953_v34 = vadd.f32 %v4463_v42, %v952_v14  ;;  %v3293_v30 = vpop.f32.mrf.mxu0 }
 0x196   :  { %v3925_v35 = vpop.eup %3924  ;;  %3950 = vpow2.f32 %v1448_v31  ;;  %v1450_v36 = vmul.f32 1.442695, %v1247_v26  ;;  %3460 = vmatmul.mubr.bf16.gmra.mxu1 %v1967_v15  ;;  %v974_v37 = vadd.f32 %v4463_v42, %v3293_v30  ;;  %v1620_v45 = vadd.f32 1.0, %v3923_v33 }
 0x197   :  { %v3927_v38 = vpop.eup %3926  ;;  %3952 = vpow2.f32 %v1444_v25  ;;  %v1245_v22 = vsub.f32 0.0, %v953_v34  ;;  %3476 = vmatpush3.bf16.msra.mxu1 %v4205_v32  ;;  %v965_v39 = vpop.f32.mrf.mxu0  ;;  %v4209_v25 = vld [vmem:[#allocation2 + $0x108] sm:$0xff]  }
 0x198   :  { %v3929_v40 = vpop.eup %3928  ;;  %3954 = vrcp.f32 %v1622_v24  ;;  %v1623_v41 = vadd.f32 1.0, %v3927_v38  ;;  %v1250_v18 = vsub.f32 0.0, %v974_v37  ;;  %3477 = vmatprep.subr.bf16.mxu1 %v4206_v43  ;;  %v966_v59 = vadd.f32 %v4463_v42, %v965_v39 }
 0x199   :  { %v3931_v44 = vpop.eup %3930  ;;  %3956 = vpow2.f32 %v1450_v36  ;;  %v1446_v46 = vmul.f32 1.442695, %v1245_v22  ;;  %v3294_v47 = vpop.f32.mrf.mxu0  ;;  %v1968_v29 = vpack.c.bf16 %v3929_v40, %v3921_v19 }
 0x19a   :  { %v3933_v48 = vpop.eup %3932  ;;  %3958 = vrcp.f32 %v1623_v41  ;;  %v1621_v49 = vadd.f32 1.0, %v3931_v44  ;;  %v1456_v50 = vmul.f32 1.442695, %v1250_v18  ;;  %v1248_v51 = vsub.f32 0.0, %v966_v59  ;;  %v4210_v44 = vld [vmem:[#allocation2 + $0x100] sm:$0xff]  }
 0x19b   :  { %v3935_v52 = vpop.eup %3934  ;;  %3960 = vpow2.f32 %v1446_v46  ;;  %3478 = vmatpush3.bf16.msra.mxu1 %v4206_v43  ;;  %v977_v21 = vadd.f32 %v4463_v42, %v3294_v47  ;;  %3463 = vmatprep.mubr.bf16.mxu1 %v1968_v29  ;;  %v968_v53 = vpop.f32.mrf.mxu0  ;;  %v1969_v54 = vpack.c.bf16 %v3925_v35, %v3933_v48 }
 0x19c   :  { %v3937_v55 = vpop.eup %3936  ;;  %3962 = vrcp.f32 %v1621_v49  ;;  %v1626_v17 = vadd.f32 1.0, %v3935_v52  ;;  %v1452_v56 = vmul.f32 1.442695, %v1248_v51  ;;  %3479 = vmatprep.subr.bf16.mxu1 %v4207_v57  ;;  %v969_v28 = vadd.f32 %v4463_v42, %v968_v53 }
 0x19d   :  { %v3939_v58 = vpop.eup %3938  ;;  %3964 = vrcp.f32 %v1620_v45  ;;  %v1251_v60 = vsub.f32 0.0, %v977_v21  ;;  %v3297_v61 = vpop.f32.mrf.mxu0 }
 0x19e   :  { %v3941_v62 = vpop.eup %3940  ;;  %3966 = vpow2.f32 %v1456_v50  ;;  %v1249_v16 = vsub.f32 0.0, %v969_v28  ;;  %3464 = vmatmul.mubr.bf16.gmra.mxu1 %v1969_v54  ;;  %v990_v63 = vadd.f32 %v4463_v42, %v3297_v61  ;;  %v1624_v7 = vadd.f32 1.0, %v3939_v58  ;;  %v4211_v28 = vld [vmem:[#allocation2 + $0x178] sm:$0xff]  }
 0x19f   :  { %v3943_v27 = vpop.eup %3942  ;;  %3968 = vpow2.f32 %v1452_v56  ;;  %v1458_v0 = vmul.f32 1.442695, %v1251_v60  ;;  %3480 = vmatpush3.bf16.msra.mxu1 %v4207_v57  ;;  %v981_v1 = vpop.f32.mrf.mxu0 }
 0x1a0   :  { %v3945_v2 = vpop.eup %3944  ;;  %3970 = vrcp.f32 %v1626_v17  ;;  %v1627_v3 = vadd.f32 1.0, %v3943_v27  ;;  %v1454_v4 = vmul.f32 1.442695, %v1249_v16  ;;  %v1254_v20 = vsub.f32 0.0, %v990_v63  ;;  %3481 = vmatprep.subr.bf16.mxu1 %v4208_v5 }
 0x1a1   :  { %v3947_v6 = vpop.eup %3946  ;;  %3972 = vpow2.f32 %v1458_v0  ;;  %v982_v8 = vadd.f32 %v4463_v42, %v981_v1  ;;  %v3298_v9 = vpop.f32.mrf.mxu0  ;;  %v1970_v10 = vpack.c.bf16 %v3945_v2, %v3937_v55 }
 0x1a2   :  { %v3949_v31 = vpop.eup %3948  ;;  %3974 = vrcp.f32 %v1627_v3  ;;  %v1625_v11 = vadd.f32 1.0, %v3947_v6  ;;  %v1464_v23 = vmul.f32 1.442695, %v1254_v20  ;;  %v993_v12 = vadd.f32 %v4463_v42, %v3298_v9  ;;  %v4212_v6 = vld [vmem:[#allocation2 + $0x170] sm:$0xff]  }
 0x1a3   :  { %v3951_v13 = vpop.eup %3950  ;;  %3976 = vpow2.f32 %v1454_v4  ;;  %v1252_v14 = vsub.f32 0.0, %v982_v8  ;;  %3482 = vmatpush3.bf16.msra.mxu1 %v4208_v5  ;;  %3467 = vmatprep.mubr.bf16.mxu1 %v1970_v10  ;;  %v984_v15 = vpop.f32.mrf.mxu0  ;;  %v1971_v32 = vpack.c.bf16 %v3941_v62, %v3949_v31 }
 0x1a4   :  { %v3953_v19 = vpop.eup %3952  ;;  %3978 = vrcp.f32 %v1625_v11  ;;  %v1255_v24 = vsub.f32 0.0, %v993_v12  ;;  %3483 = vmatprep.subr.bf16.mxu1 %v4209_v25  ;;  %v985_v26 = vadd.f32 %v4463_v42, %v984_v15  ;;  %v1630_v47 = vadd.f32 1.0, %v3951_v13 }
 0x1a5   :  { %v3955_v33 = vpop.eup %3954  ;;  %3980 = vrcp.f32 %v1624_v7  ;;  %v1628_v34 = vadd.f32 1.0, %v3953_v19  ;;  %v1460_v30 = vmul.f32 1.442695, %v1252_v14  ;;  %v3301_v35 = vpop.f32.mrf.mxu0 }
 0x1a6   :  { %v3957_v36 = vpop.eup %3956  ;;  %3982 = vpow2.f32 %v1464_v23  ;;  %v1466_v37 = vmul.f32 1.442695, %v1255_v24  ;;  %v1253_v38 = vsub.f32 0.0, %v985_v26  ;;  %3468 = vmatmul.mubr.bf16.gmra.mxu1 %v1971_v32  ;;  %v1006_v22 = vadd.f32 %v4463_v42, %v3301_v35 }
 0x1a7   :  { %v3959_v39 = vpop.eup %3958  ;;  %3984 = vrcp.f32 %v1628_v34  ;;  %v1631_v40 = vadd.f32 1.0, %v3957_v36  ;;  %3484 = vmatpush3.bf16.msra.mxu1 %v4209_v25  ;;  %v997_v41 = vpop.f32.mrf.mxu0  ;;  %v4213_v34 = vld [vmem:[#allocation2 + $0x168] sm:$0xff]  }
 0x1a8   :  { %v3961_v18 = vpop.eup %3960  ;;  %3986 = vpow2.f32 %v1460_v30  ;;  %v1462_v43 = vmul.f32 1.442695, %v1253_v38  ;;  %v1258_v59 = vsub.f32 0.0, %v1006_v22  ;;  %3485 = vmatprep.subr.bf16.mxu1 %v4210_v44  ;;  %v998_v45 = vadd.f32 %v4463_v42, %v997_v41 }
 0x1a9   :  { %v3963_v46 = vpop.eup %3962  ;;  %3988 = vrcp.f32 %v1631_v40  ;;  %v1629_v29 = vadd.f32 1.0, %v3961_v18  ;;  %v3302_v48 = vpop.f32.mrf.mxu0  ;;  %v1973_v55 = vpack.c.bf16 %v3959_v39, %v3955_v33 }
 0x1aa   :  { %v3965_v49 = vpop.eup %3964  ;;  %3990 = vpow2.f32 %v1466_v37  ;;  %v1472_v50 = vmul.f32 1.442695, %v1258_v59  ;;  %v1256_v51 = vsub.f32 0.0, %v998_v45  ;;  %v1009_v52 = vadd.f32 %v4463_v42, %v3302_v48 }
 0x1ab   :  { %v3967_v21 = vpop.eup %3966  ;;  %3992 = vrcp.f32 %v1629_v29  ;;  %3486 = vmatpush3.bf16.msra.mxu1 %v4210_v44  ;;  %v1972_v53 = vpack.c.bf16 %v3963_v46, %v3965_v49  ;;  %v1000_v54 = vpop.f32.mrf.mxu0  ;;  %v4214_v44 = vld [vmem:[#allocation2 + $0x160] sm:$0xff]  }
 0x1ac   :  { %v3969_v17 = vpop.eup %3968  ;;  %3994 = vpow2.f32 %v1462_v43  ;;  %v1468_v56 = vmul.f32 1.442695, %v1256_v51  ;;  %v1259_v57 = vsub.f32 0.0, %v1009_v52  ;;  %3503 = vmatprep.subr.bf16.mxu1 %v4211_v28  ;;  %v1001_v58 = vadd.f32 %v4463_v42, %v1000_v54 }
 0x1ad   :  { %v3971_v60 = vpop.eup %3970  ;;  %3996 = vrcp.f32 %v1630_v47  ;;  %v1632_v61 = vadd.f32 1.0, %v3969_v17  ;;  %3487 = vmatprep.mubr.bf16.mxu1 %v1972_v53  ;;  %v3305_v62 = vpop.f32.mrf.mxu0  ;;  %v1634_v9 = vadd.f32 1.0, %v3967_v21 }
 0x1ae   :  { %v3973_v16 = vpop.eup %3972  ;;  %3998 = vpow2.f32 %v1472_v50  ;;  %v1474_v63 = vmul.f32 1.442695, %v1259_v57  ;;  %v1257_v27 = vsub.f32 0.0, %v1001_v58  ;;  %3488 = vmatmul.mubr.bf16.vlgmr.msra.gmra.mxu1 %v1973_v55  ;;  %v1022_v0 = vadd.f32 %v4463_v42, %v3305_v62  ;;  %v4215_v58 = vld [vmem:[#allocation2 + $0x158] sm:$0xff]  }
 0x1af   :  { %v3975_v1 = vpop.eup %3974  ;;  %4000 = vrcp.f32 %v1632_v61  ;;  %v1635_v2 = vadd.f32 1.0, %v3973_v16  ;;  %3504 = vmatpush3.bf16.msra.mxu1 %v4211_v28  ;;  %v1013_v3 = vpop.f32.mrf.mxu0 }
 0x1b0   :  { %v3977_v4 = vpop.eup %3976  ;;  %4002 = vpow2.f32 %v1468_v56  ;;  %v1470_v20 = vmul.f32 1.442695, %v1257_v27  ;;  %v1262_v5 = vsub.f32 0.0, %v1022_v0  ;;  %3505 = vmatprep.subr.bf16.mxu1 %v4212_v6  ;;  %v1014_v7 = vadd.f32 %v4463_v42, %v1013_v3 }
 0x1b1   :  { %v3979_v8 = vpop.eup %3978  ;;  %4004 = vrcp.f32 %v1635_v2  ;;  %v1633_v10 = vadd.f32 1.0, %v3977_v4  ;;  %v3306_v31 = vpop.f32.mrf.mxu0  ;;  %v1975_v24 = vpack.c.bf16 %v3975_v1, %v3971_v60 }
 0x1b2   :  { %v3981_v11 = vpop.eup %3980  ;;  %4006 = vpow2.f32 %v1474_v63  ;;  %v1480_v23 = vmul.f32 1.442695, %v1262_v5  ;;  %v1260_v12 = vsub.f32 0.0, %v1014_v7  ;;  %v1025_v13 = vadd.f32 %v4463_v42, %v3306_v31  ;;  %v4216_v7 = vld [vmem:[#allocation2 + $0x150] sm:$0xff]  }
 0x1b3   :  { %v3983_v14 = vpop.eup %3982  ;;  %4008 = vrcp.f32 %v1633_v10  ;;  %3506 = vmatpush3.bf16.msra.mxu1 %v4212_v6  ;;  %v1974_v15 = vpack.c.bf16 %v3979_v8, %v3981_v11  ;;  %v1016_v19 = vpop.f32.mrf.mxu0 }
 0x1b4   :  { %v3985_v25 = vpop.eup %3984  ;;  %v1638_v26 = vadd.f32 1.0, %v3983_v14  ;;  %4010 = vpow2.f32 %v1470_v20  ;;  %v1476_v32 = vmul.f32 1.442695, %v1260_v12  ;;  %v1263_v33 = vsub.f32 0.0, %v1025_v13  ;;  %3507 = vmatprep.subr.bf16.mxu1 %v4213_v34 }
 0x1b5   :  { %v3987_v30 = vpop.eup %3986  ;;  %4012 = vrcp.f32 %v1634_v9  ;;  %3491 = vmatprep.mubr.bf16.mxu1 %v1974_v15  ;;  %v1017_v35 = vadd.f32 %v4463_v42, %v1016_v19  ;;  %v3309_v36 = vpop.f32.mrf.mxu0 }
 0x1b6   :  { %v3989_v37 = vpop.eup %3988  ;;  %4014 = vpow2.f32 %v1480_v23  ;;  %v1482_v38 = vmul.f32 1.442695, %v1263_v33  ;;  %3492 = vmatmul.mubr.bf16.gmra.mxu1 %v1975_v24  ;;  %v1038_v22 = vadd.f32 %v4463_v42, %v3309_v36  ;;  %v1636_v47 = vadd.f32 1.0, %v3987_v30 }
 0x1b7   :  { %v3991_v39 = vpop.eup %3990  ;;  %4016 = vpow2.f32 %v1476_v32  ;;  %v1261_v40 = vsub.f32 0.0, %v1017_v35  ;;  %3508 = vmatpush3.bf16.msra.mxu1 %v4213_v34  ;;  %v1029_v41 = vpop.f32.mrf.mxu0  ;;  %v4217_v32 = vld [vmem:[#allocation2 + $0x148] sm:$0xff]  }
 0x1b8   :  { %v3993_v18 = vpop.eup %3992  ;;  %4018 = vrcp.f32 %v1638_v26  ;;  %v1639_v43 = vadd.f32 1.0, %v3991_v39  ;;  %v1266_v59 = vsub.f32 0.0, %v1038_v22  ;;  %3509 = vmatprep.subr.bf16.mxu1 %v4214_v44  ;;  %v1030_v45 = vadd.f32 %v4463_v42, %v1029_v41 }
 0x1b9   :  { %v3995_v46 = vpop.eup %3994  ;;  %4020 = vpow2.f32 %v1482_v38  ;;  %v1478_v29 = vmul.f32 1.442695, %v1261_v40  ;;  %v3310_v48 = vpop.f32.mrf.mxu0  ;;  %v1976_v49 = vpack.c.bf16 %v3993_v18, %v3985_v25  ;;  %v4515_v40 = vld [vmem:[%s4553_s2] ss:$0 sm:$0xff]  ;;  %s4306_s2 = smov [#allocation7]  }
 0x1ba   :  { %v3997_v50 = vpop.eup %3996  ;;  %4022 = vrcp.f32 %v1639_v43  ;;  %v1637_v51 = vadd.f32 1.0, %v3995_v46  ;;  %v1488_v52 = vmul.f32 1.442695, %v1266_v59  ;;  %v1264_v21 = vsub.f32 0.0, %v1030_v45  ;;  %v4219_v46 = vld [vmem:[#allocation2 + $0x140] sm:$0xff]   ;;  %s2913_s28 = sshll.u32 %s4306_s2, 4  ;;  %s2914_s28 = int_to_ptr.vmem [resolvable:$true] %s2913_s28 }
 0x1bb   :  { %v3999_v53 = vpop.eup %3998  ;;  %4024 = vpow2.f32 %v1478_v29  ;;  %3510 = vmatpush3.bf16.msra.mxu1 %v4214_v44  ;;  %v1041_v54 = vadd.f32 %v4463_v42, %v3310_v48  ;;  %3495 = vmatprep.mubr.bf16.mxu1 %v1976_v49  ;;  %v1032_v55 = vpop.f32.mrf.mxu0  ;;  %v1977_v17 = vpack.c.bf16 %v3989_v37, %v3997_v50  ;;  %s4276_s29 = scalar_lea.vmem %s2914_s28, 16384  ;;  %p4281_p11 = scmp.lt.s32.totalorder %s2914_s28, %s2914_s28 }
 0x1bc   :  { %v4001_v56 = vpop.eup %4000  ;;  %4026 = vrcp.f32 %v1637_v51  ;;  %v1642_v57 = vadd.f32 1.0, %v3999_v53  ;;  %v1484_v28 = vmul.f32 1.442695, %v1264_v21  ;;  %3511 = vmatprep.subr.bf16.mxu1 %v4215_v58  ;;  %v1033_v60 = vadd.f32 %v4463_v42, %v1032_v55  ;;  %p4277_p10 = scmp.ne.s32.totalorder %s2914_s28, %s4276_s29  ;;  %p4282_p12 = scmp.lt.s32.totalorder %s4276_s29, %s4276_s29 }
 0x1bd   :  { %v4003_v61 = vpop.eup %4002  ;;  %4028 = vrcp.f32 %v1636_v47  ;;  %v1267_v62 = vsub.f32 0.0, %v1041_v54  ;;  %v3313_v16 = vpop.f32.mrf.mxu0 }
 0x1be   :  { %v4005_v63 = vpop.eup %4004  ;;  %4030 = vpow2.f32 %v1488_v52  ;;  %v1265_v27 = vsub.f32 0.0, %v1033_v60  ;;  %3496 = vmatmul.mubr.bf16.gmra.mxu1 %v1977_v17  ;;  %v1054_v0 = vadd.f32 %v4463_v42, %v3313_v16  ;;  %v1640_v9 = vadd.f32 1.0, %v4003_v61  ;;  %v4220_v60 = vld [vmem:[#allocation2 + $0x1b8] sm:$0xff]   ;;  %p4283_p13 = por %p4282_p12, %p4281_p11 }
 0x1bf   :  { %v4007_v1 = vpop.eup %4006  ;;  %4032 = vpow2.f32 %v1484_v28  ;;  %v1490_v2 = vmul.f32 1.442695, %v1267_v62  ;;  %3512 = vmatpush3.bf16.msra.mxu1 %v4215_v58  ;;  %v1045_v3 = vpop.f32.mrf.mxu0 }
 0x1c0   :  { %v4009_v4 = vpop.eup %4008  ;;  %4034 = vrcp.f32 %v1642_v57  ;;  %v1643_v20 = vadd.f32 1.0, %v4007_v1  ;;  %v1486_v5 = vmul.f32 1.442695, %v1265_v27  ;;  %v1270_v6 = vsub.f32 0.0, %v1054_v0  ;;  %3513 = vmatprep.subr.bf16.mxu1 %v4216_v7  ;;  %p4284_p0 = pnand %p4283_p13, %p4277_p10 }
 0x1c1   :  { %v4011_v8 = vpop.eup %4010  ;;  %4036 = vpow2.f32 %v1490_v2  ;;  %v1046_v10 = vadd.f32 %v4463_v42, %v1045_v3  ;;  %v3314_v31 = vpop.f32.mrf.mxu0  ;;  %v1978_v11 = vpack.c.bf16 %v4009_v4, %v4001_v56 }
 0x1c2   :  { %v4013_v23 = vpop.eup %4012  ;;  %4038 = vrcp.f32 %v1643_v20  ;;  %v1641_v12 = vadd.f32 1.0, %v4011_v8  ;;  %v1496_v13 = vmul.f32 1.442695, %v1270_v6  ;;  %v1057_v14 = vadd.f32 %v4463_v42, %v3314_v31  ;;  %v4221_v8 = vld [vmem:[#allocation2 + $0x1b0] sm:$0xff]  }
 0x1c3   :  { %v4015_v15 = vpop.eup %4014  ;;  %4040 = vpow2.f32 %v1486_v5  ;;  %v1268_v19 = vsub.f32 0.0, %v1046_v10  ;;  %3514 = vmatpush3.bf16.msra.mxu1 %v4216_v7  ;;  %3499 = vmatprep.mubr.bf16.mxu1 %v1978_v11  ;;  %v1048_v24 = vpop.f32.mrf.mxu0  ;;  %v1979_v34 = vpack.c.bf16 %v4005_v63, %v4013_v23 }
 0x1c4   :  { %v4017_v25 = vpop.eup %4016  ;;  %4042 = vrcp.f32 %v1641_v12  ;;  %v1271_v26 = vsub.f32 0.0, %v1057_v14  ;;  %3515 = vmatprep.subr.bf16.mxu1 %v4217_v32  ;;  %v1049_v33 = vadd.f32 %v4463_v42, %v1048_v24  ;;  %v1646_v48 = vadd.f32 1.0, %v4015_v15 }
 0x1c5   :  { %v4019_v30 = vpop.eup %4018  ;;  %4044 = vrcp.f32 %v1640_v9  ;;  %v1644_v35 = vadd.f32 1.0, %v4017_v25  ;;  %v1492_v36 = vmul.f32 1.442695, %v1268_v19  ;;  %v3317_v37 = vpop.f32.mrf.mxu0 }
 0x1c6   :  { %v4021_v38 = vpop.eup %4020  ;;  %4046 = vpow2.f32 %v1496_v13  ;;  %v1498_v22 = vmul.f32 1.442695, %v1271_v26  ;;  %v1269_v39 = vsub.f32 0.0, %v1049_v33  ;;  %3500 = vmatmul.mubr.bf16.gmra.mxu1 %v1979_v34  ;;  %v1070_v41 = vadd.f32 %v4515_v40, %v3317_v37 }
 0x1c7   :  { %v4023_v18 = vpop.eup %4022  ;;  %4048 = vrcp.f32 %v1644_v35  ;;  %v1647_v42 = vadd.f32 1.0, %v4021_v38  ;;  %3516 = vmatpush3.bf16.msra.mxu1 %v4217_v32  ;;  %v1061_v43 = vpop.f32.mrf.mxu0  ;;  %v4222_v35 = vld [vmem:[#allocation2 + $0x1a8] sm:$0xff]  }
 0x1c8   :  { %v4025_v59 = vpop.eup %4024  ;;  %4050 = vpow2.f32 %v1492_v36  ;;  %v1494_v44 = vmul.f32 1.442695, %v1269_v39  ;;  %v1274_v45 = vsub.f32 0.0, %v1070_v41  ;;  %3517 = vmatprep.subr.bf16.mxu1 %v4219_v46  ;;  %v1062_v47 = vadd.f32 %v4515_v40, %v1061_v43 }
 0x1c9   :  { %v4027_v29 = vpop.eup %4026  ;;  %4052 = vrcp.f32 %v1647_v42  ;;  %v1645_v49 = vadd.f32 1.0, %v4025_v59  ;;  %v3318_v50 = vpop.f32.mrf.mxu0  ;;  %v1981_v56 = vpack.c.bf16 %v4023_v18, %v4019_v30 }
 0x1ca   :  { %v4029_v51 = vpop.eup %4028  ;;  %4054 = vpow2.f32 %v1498_v22  ;;  %v1504_v52 = vmul.f32 1.442695, %v1274_v45  ;;  %v1272_v21 = vsub.f32 0.0, %v1062_v47  ;;  %v1073_v53 = vadd.f32 %v4515_v40, %v3318_v50 }
 0x1cb   :  { %v4031_v54 = vpop.eup %4030  ;;  %4056 = vrcp.f32 %v1645_v49  ;;  %3518 = vmatpush3.bf16.msra.mxu1 %v4219_v46  ;;  %v1980_v55 = vpack.c.bf16 %v4027_v29, %v4029_v51  ;;  %v1064_v17 = vpop.f32.mrf.mxu0  ;;  %v4223_v46 = vld [vmem:[#allocation2 + $0x1a0] sm:$0xff]  }
 0x1cc   :  { %v4033_v57 = vpop.eup %4032  ;;  %4058 = vpow2.f32 %v1494_v44  ;;  %v1500_v28 = vmul.f32 1.442695, %v1272_v21  ;;  %v1275_v58 = vsub.f32 0.0, %v1073_v53  ;;  %3535 = vmatprep.subr.bf16.mxu1 %v4220_v60  ;;  %v1065_v61 = vadd.f32 %v4515_v40, %v1064_v17 }
 0x1cd   :  { %v4035_v62 = vpop.eup %4034  ;;  %4060 = vrcp.f32 %v1646_v48  ;;  %v1648_v16 = vadd.f32 1.0, %v4033_v57  ;;  %3519 = vmatprep.mubr.bf16.mxu1 %v1980_v55  ;;  %v3321_v63 = vpop.f32.mrf.mxu0  ;;  %v1650_v31 = vadd.f32 1.0, %v4031_v54 }
 0x1ce   :  { %v4037_v27 = vpop.eup %4036  ;;  %4062 = vpow2.f32 %v1504_v52  ;;  %v1506_v0 = vmul.f32 1.442695, %v1275_v58  ;;  %v1273_v1 = vsub.f32 0.0, %v1065_v61  ;;  %3520 = vmatmul.mubr.bf16.vlgmr.msra.gmra.mxu1 %v1981_v56  ;;  %v1086_v2 = vadd.f32 %v4515_v40, %v3321_v63  ;;  %v4224_v61 = vld [vmem:[#allocation2 + $0x198] sm:$0xff]  }
 0x1cf   :  { %v4039_v3 = vpop.eup %4038  ;;  %4064 = vrcp.f32 %v1648_v16  ;;  %v1651_v4 = vadd.f32 1.0, %v4037_v27  ;;  %3536 = vmatpush3.bf16.msra.mxu1 %v4220_v60  ;;  %v1077_v20 = vpop.f32.mrf.mxu0 }
 0x1d0   :  { %v4041_v5 = vpop.eup %4040  ;;  %4066 = vpow2.f32 %v1500_v28  ;;  %v1502_v6 = vmul.f32 1.442695, %v1273_v1  ;;  %v1278_v7 = vsub.f32 0.0, %v1086_v2  ;;  %3537 = vmatprep.subr.bf16.mxu1 %v4221_v8  ;;  %v1078_v9 = vadd.f32 %v4515_v40, %v1077_v20 }
 0x1d1   :  { %v4043_v10 = vpop.eup %4042  ;;  %4068 = vrcp.f32 %v1651_v4  ;;  %v1649_v11 = vadd.f32 1.0, %v4041_v5  ;;  %v3322_v23 = vpop.f32.mrf.mxu0  ;;  %v1983_v26 = vpack.c.bf16 %v4039_v3, %v4035_v62 }
 0x1d2   :  { %v4045_v12 = vpop.eup %4044  ;;  %4070 = vpow2.f32 %v1506_v0  ;;  %v1512_v13 = vmul.f32 1.442695, %v1278_v7  ;;  %v1276_v14 = vsub.f32 0.0, %v1078_v9  ;;  %v1089_v15 = vadd.f32 %v4515_v40, %v3322_v23  ;;  %v4225_v9 = vld [vmem:[#allocation2 + $0x190] sm:$0xff]  }
 0x1d3   :  { %v4047_v19 = vpop.eup %4046  ;;  %4072 = vrcp.f32 %v1649_v11  ;;  %3538 = vmatpush3.bf16.msra.mxu1 %v4221_v8  ;;  %v1982_v24 = vpack.c.bf16 %v4043_v10, %v4045_v12  ;;  %v1080_v25 = vpop.f32.mrf.mxu0 }
 0x1d4   :  { %v4049_v32 = vpop.eup %4048  ;;  %v1654_v33 = vadd.f32 1.0, %v4047_v19  ;;  %4074 = vpow2.f32 %v1502_v6  ;;  %v1508_v34 = vmul.f32 1.442695, %v1276_v14  ;;  %v1279_v30 = vsub.f32 0.0, %v1089_v15  ;;  %3539 = vmatprep.subr.bf16.mxu1 %v4222_v35 }
 0x1d5   :  { %v4051_v36 = vpop.eup %4050  ;;  %4076 = vrcp.f32 %v1650_v31  ;;  %3523 = vmatprep.mubr.bf16.mxu1 %v1982_v24  ;;  %v1081_v37 = vadd.f32 %v4515_v40, %v1080_v25  ;;  %v3325_v38 = vpop.f32.mrf.mxu0 }
 0x1d6   :  { %v4053_v22 = vpop.eup %4052  ;;  %4078 = vpow2.f32 %v1512_v13  ;;  %v1514_v39 = vmul.f32 1.442695, %v1279_v30  ;;  %3524 = vmatmul.mubr.bf16.gmra.mxu1 %v1983_v26  ;;  %v1102_v41 = vadd.f32 %v4515_v40, %v3325_v38  ;;  %v1652_v48 = vadd.f32 1.0, %v4051_v36 }
 0x1d7   :  { %v4055_v18 = vpop.eup %4054  ;;  %4080 = vpow2.f32 %v1508_v34  ;;  %v1277_v42 = vsub.f32 0.0, %v1081_v37  ;;  %3540 = vmatpush3.bf16.msra.mxu1 %v4222_v35  ;;  %v1093_v43 = vpop.f32.mrf.mxu0  ;;  %v4226_v34 = vld [vmem:[#allocation2 + $0x188] sm:$0xff]  }
 0x1d8   :  { %v4057_v59 = vpop.eup %4056  ;;  %4082 = vrcp.f32 %v1654_v33  ;;  %v1655_v44 = vadd.f32 1.0, %v4055_v18  ;;  %v1282_v45 = vsub.f32 0.0, %v1102_v41  ;;  %3541 = vmatprep.subr.bf16.mxu1 %v4223_v46  ;;  %v1094_v47 = vadd.f32 %v4515_v40, %v1093_v43 }
 0x1d9   :  { %v4059_v29 = vpop.eup %4058  ;;  %4084 = vpow2.f32 %v1514_v39  ;;  %v1510_v49 = vmul.f32 1.442695, %v1277_v42  ;;  %v3326_v50 = vpop.f32.mrf.mxu0  ;;  %v1984_v51 = vpack.c.bf16 %v4057_v59, %v4049_v32 }
 0x1da   :  { %v4061_v52 = vpop.eup %4060  ;;  %4086 = vrcp.f32 %v1655_v44  ;;  %v1653_v21 = vadd.f32 1.0, %v4059_v29  ;;  %v1520_v53 = vmul.f32 1.442695, %v1282_v45  ;;  %v1280_v54 = vsub.f32 0.0, %v1094_v47  ;;  %v4227_v29 = vld [vmem:[#allocation2 + $0x180] sm:$0xff]  }
 0x1db   :  { %v4063_v55 = vpop.eup %4062  ;;  %4088 = vpow2.f32 %v1510_v49  ;;  %3542 = vmatpush3.bf16.msra.mxu1 %v4223_v46  ;;  %v1105_v17 = vadd.f32 %v4515_v40, %v3326_v50  ;;  %3527 = vmatprep.mubr.bf16.mxu1 %v1984_v51  ;;  %v1096_v56 = vpop.f32.mrf.mxu0  ;;  %v1985_v57 = vpack.c.bf16 %v4053_v22, %v4061_v52 }
 0x1dc   :  { %v4065_v28 = vpop.eup %4064  ;;  %4090 = vrcp.f32 %v1653_v21  ;;  %v1658_v58 = vadd.f32 1.0, %v4063_v55  ;;  %v1516_v60 = vmul.f32 1.442695, %v1280_v54  ;;  %3543 = vmatprep.subr.bf16.mxu1 %v4224_v61  ;;  %v1097_v62 = vadd.f32 %v4515_v40, %v1096_v56 }
 0x1dd   :  { %v4067_v16 = vpop.eup %4066  ;;  %4092 = vrcp.f32 %v1652_v48  ;;  %v1283_v63 = vsub.f32 0.0, %v1105_v17  ;;  %v3329_v27 = vpop.f32.mrf.mxu0 }
 0x1de   :  { %v4069_v0 = vpop.eup %4068  ;;  %4094 = vpow2.f32 %v1520_v53  ;;  %v1281_v1 = vsub.f32 0.0, %v1097_v62  ;;  %3528 = vmatmul.mubr.bf16.gmra.mxu1 %v1985_v57  ;;  %v1118_v2 = vadd.f32 %v4515_v40, %v3329_v27  ;;  %v1656_v31 = vadd.f32 1.0, %v4067_v16  ;;  %v4228_v62 = vld [vmem:[#allocation2 + $0x1f8] sm:$0xff]  }
 0x1df   :  { %v4071_v3 = vpop.eup %4070  ;;  %4096 = vpow2.f32 %v1516_v60  ;;  %v1522_v4 = vmul.f32 1.442695, %v1283_v63  ;;  %3544 = vmatpush3.bf16.msra.mxu1 %v4224_v61  ;;  %v1109_v20 = vpop.f32.mrf.mxu0 }
 0x1e0   :  { %v4073_v5 = vpop.eup %4072  ;;  %4098 = vrcp.f32 %v1658_v58  ;;  %v1659_v6 = vadd.f32 1.0, %v4071_v3  ;;  %v1518_v7 = vmul.f32 1.442695, %v1281_v1  ;;  %v1286_v8 = vsub.f32 0.0, %v1118_v2  ;;  %3545 = vmatprep.subr.bf16.mxu1 %v4225_v9 }
 0x1e1   :  { %v4075_v10 = vpop.eup %4074  ;;  %4100 = vpow2.f32 %v1522_v4  ;;  %v1110_v11 = vadd.f32 %v4515_v40, %v1109_v20  ;;  %v3330_v23 = vpop.f32.mrf.mxu0  ;;  %v1986_v12 = vpack.c.bf16 %v4073_v5, %v4065_v28 }
 0x1e2   :  { %v4077_v13 = vpop.eup %4076  ;;  %4102 = vrcp.f32 %v1659_v6  ;;  %v1657_v14 = vadd.f32 1.0, %v4075_v10  ;;  %v1528_v15 = vmul.f32 1.442695, %v1286_v8  ;;  %v1121_v19 = vadd.f32 %v4515_v40, %v3330_v23 }
 0x1e3   :  { %v4079_v24 = vpop.eup %4078  ;;  %4104 = vpow2.f32 %v1518_v7  ;;  %v1284_v25 = vsub.f32 0.0, %v1110_v11  ;;  %3546 = vmatpush3.bf16.msra.mxu1 %v4225_v9  ;;  %3531 = vmatprep.mubr.bf16.mxu1 %v1986_v12  ;;  %v1112_v26 = vpop.f32.mrf.mxu0  ;;  %v1987_v35 = vpack.c.bf16 %v4069_v0, %v4077_v13  ;;  %v4229_v11 = vld [vmem:[#allocation2 + $0x1f0] sm:$0xff]  }
 0x1e4   :  { %v4081_v32 = vpop.eup %4080  ;;  %4106 = vrcp.f32 %v1657_v14  ;;  %v1287_v33 = vsub.f32 0.0, %v1121_v19  ;;  %3547 = vmatprep.subr.bf16.mxu1 %v4226_v34  ;;  %v1113_v30 = vadd.f32 %v4515_v40, %v1112_v26  ;;  %v1662_v50 = vadd.f32 1.0, %v4079_v24 }
 0x1e5   :  { %v4083_v36 = vpop.eup %4082  ;;  %4108 = vrcp.f32 %v1656_v31  ;;  %v1660_v37 = vadd.f32 1.0, %v4081_v32  ;;  %v1524_v38 = vmul.f32 1.442695, %v1284_v25  ;;  %v3333_v22 = vpop.f32.mrf.mxu0 }
 0x1e6   :  { %v4085_v39 = vpop.eup %4084  ;;  %4110 = vpow2.f32 %v1528_v15  ;;  %v1530_v41 = vmul.f32 1.442695, %v1287_v33  ;;  %v1285_v18 = vsub.f32 0.0, %v1113_v30  ;;  %3532 = vmatmul.mubr.bf16.gmra.mxu1 %v1987_v35  ;;  %v1134_v42 = vadd.f32 %v4515_v40, %v3333_v22  ;;  %v4230_v22 = vld [vmem:[#allocation2 + $0x1e8] sm:$0xff]  }
 0x1e7   :  { %v4087_v43 = vpop.eup %4086  ;;  %4112 = vrcp.f32 %v1660_v37  ;;  %v1663_v59 = vadd.f32 1.0, %v4085_v39  ;;  %3548 = vmatpush3.bf16.msra.mxu1 %v4226_v34  ;;  %v1125_v44 = vpop.f32.mrf.mxu0 }
 0x1e8   :  { %v4089_v45 = vpop.eup %4088  ;;  %4114 = vpow2.f32 %v1524_v38  ;;  %v1526_v46 = vmul.f32 1.442695, %v1285_v18  ;;  %v1290_v47 = vsub.f32 0.0, %v1134_v42  ;;  %3549 = vmatprep.subr.bf16.mxu1 %v4227_v29  ;;  %v1126_v48 = vadd.f32 %v4515_v40, %v1125_v44 }
 0x1e9   :  { %v4091_v49 = vpop.eup %4090  ;;  %4116 = vrcp.f32 %v1663_v59  ;;  %v1661_v51 = vadd.f32 1.0, %v4089_v45  ;;  %v3334_v52 = vpop.f32.mrf.mxu0  ;;  %v1989_v28 = vpack.c.bf16 %v4087_v43, %v4083_v36 }
 0x1ea   :  { %v4093_v21 = vpop.eup %4092  ;;  %4118 = vpow2.f32 %v1530_v41  ;;  %v1536_v53 = vmul.f32 1.442695, %v1290_v47  ;;  %v1288_v54 = vsub.f32 0.0, %v1126_v48  ;;  %v1137_v55 = vadd.f32 %v4515_v40, %v3334_v52 }
 0x1eb   :  { %v4095_v17 = vpop.eup %4094  ;;  %4120 = vrcp.f32 %v1661_v51  ;;  %3550 = vmatpush3.bf16.msra.mxu1 %v4227_v29  ;;  %v1988_v56 = vpack.c.bf16 %v4091_v49, %v4093_v21  ;;  %v1128_v57 = vpop.f32.mrf.mxu0  ;;  %v4231_v21 = vld [vmem:[#allocation2 + $0x1e0] sm:$0xff]  }
 0x1ec   :  { %v4097_v58 = vpop.eup %4096  ;;  %4122 = vpow2.f32 %v1526_v46  ;;  %v1532_v60 = vmul.f32 1.442695, %v1288_v54  ;;  %v1291_v61 = vsub.f32 0.0, %v1137_v55  ;;  %3567 = vmatprep.subr.bf16.mxu1 %v4228_v62  ;;  %v1129_v16 = vadd.f32 %v4515_v40, %v1128_v57  ;;  %v3361_v63 = vpop.f32.mrf.mxu1 }
 0x1ed   :  { %v4537_v27 = vpop.eup %4098  ;;  %4124 = vrcp.f32 %v1662_v50  ;;  %v1664_v0 = vadd.f32 1.0, %v4097_v58  ;;  %3551 = vmatprep.mubr.bf16.mxu1 %v1988_v56  ;;  %2782 = vst [vmem:[#allocation7 + $0x10] sm:$0xff] %v3361_v63  ;;  %v3337_v1 = vpop.f32.mrf.mxu0  ;;  %v1666_v14 = vadd.f32 1.0, %v4095_v17 }
 0x1ee   :  { %v4101_v2 = vpop.eup %4100  ;;  %4126 = vpow2.f32 %v1536_v53  ;;  %v1538_v3 = vmul.f32 1.442695, %v1291_v61  ;;  %v1289_v4 = vsub.f32 0.0, %v1129_v16  ;;  %3552 = vmatmul.mubr.bf16.vlgmr.msra.gmra.mxu1 %v1989_v28  ;;  %v1150_v20 = vadd.f32 %v4515_v40, %v3337_v1  ;;  %v2038_v5 = vpop.f32.mrf.mxu1 }
 0x1ef   :  { %v4103_v6 = vpop.eup %4102  ;;  %4128 = vrcp.f32 %v1664_v0  ;;  %v1667_v7 = vadd.f32 1.0, %v4101_v2  ;;  %3568 = vmatpush3.bf16.msra.mxu1 %v4228_v62  ;;  %2780 = vst [vmem:[#allocation7] sm:$0xff] %v2038_v5  ;;  %v1141_v8 = vpop.f32.mrf.mxu0 }
 0x1f0   :  { %v4105_v9 = vpop.eup %4104  ;;  %4130 = vpow2.f32 %v1532_v60  ;;  %v1534_v10 = vmul.f32 1.442695, %v1289_v4  ;;  %v1294_v31 = vsub.f32 0.0, %v1150_v20  ;;  %3569 = vmatprep.subr.bf16.mxu1 %v4229_v11  ;;  %v1142_v23 = vadd.f32 %v4515_v40, %v1141_v8  ;;  %v3362_v12 = vpop.f32.mrf.mxu1 }
 0x1f1   :  { %v4107_v13 = vpop.eup %4106  ;;  %4132 = vrcp.f32 %v1667_v7  ;;  %v1665_v15 = vadd.f32 1.0, %v4105_v9  ;;  %2783 = vst [vmem:[#allocation7 + $0x18] sm:$0xff] %v3362_v12  ;;  %v3338_v19 = vpop.f32.mrf.mxu0  ;;  %v1991_v41 = vpack.c.bf16 %v4103_v6, %v4537_v27 }
 0x1f2   :  { %v4109_v24 = vpop.eup %4108  ;;  %4134 = vpow2.f32 %v1538_v3  ;;  %v1544_v25 = vmul.f32 1.442695, %v1294_v31  ;;  %v1292_v26 = vsub.f32 0.0, %v1142_v23  ;;  %v1153_v32 = vadd.f32 %v4515_v40, %v3338_v19  ;;  %v2041_v33 = vpop.f32.mrf.mxu1  ;;  %v4232_v3 = vld [vmem:[#allocation2 + $0x1d8] sm:$0xff]  }
 0x1f3   :  { %v4111_v34 = vpop.eup %4110  ;;  %4136 = vrcp.f32 %v1665_v15  ;;  %3570 = vmatpush3.bf16.msra.mxu1 %v4229_v11  ;;  %2781 = vst [vmem:[#allocation7 + $0x8] sm:$0xff] %v2041_v33  ;;  %v1990_v30 = vpack.c.bf16 %v4107_v13, %v4109_v24  ;;  %v1144_v35 = vpop.f32.mrf.mxu0 }
 0x1f4   :  { %v4113_v36 = vpop.eup %4112  ;;  %4138 = vpow2.f32 %v1534_v10  ;;  %v1540_v37 = vmul.f32 1.442695, %v1292_v26  ;;  %v1295_v38 = vsub.f32 0.0, %v1153_v32  ;;  %3571 = vmatprep.subr.bf16.mxu1 %v4230_v22  ;;  %v3365_v39 = vpop.f32.mrf.mxu1  ;;  %v1145_v42 = vadd.f32 %v4515_v40, %v1144_v35  ;;  %v4234_v35 = vld [vmem:[#allocation2 + $0x1c8] sm:$0xff]  }
 0x1f5   :  { %v4115_v18 = vpop.eup %4114  ;;  %4140 = vrcp.f32 %v1666_v14  ;;  %3555 = vmatprep.mubr.bf16.mxu1 %v1990_v30  ;;  %2786 = vst [vmem:[#allocation7 + $0x30] sm:$0xff] %v3365_v39  ;;  %v3341_v43 = vpop.f32.mrf.mxu0  ;;  %v1670_v17 = vadd.f32 1.0, %v4111_v34  ;;  %v4233_v14 = vld [vmem:[#allocation2 + $0x1d0] sm:$0xff]  }
 0x1f6   :  { %v4117_v59 = vpop.eup %4116  ;;  %v1668_v44 = vadd.f32 1.0, %v4115_v18  ;;  %4142 = vpow2.f32 %v1544_v25  ;;  %v1546_v45 = vmul.f32 1.442695, %v1295_v38  ;;  %3556 = vmatmul.mubr.bf16.gmra.mxu1 %v1991_v41  ;;  %v1166_v46 = vadd.f32 %v4515_v40, %v3341_v43  ;;  %v2054_v47 = vpop.f32.mrf.mxu1 }
 0x1f7   :  { %v4119_v29 = vpop.eup %4118  ;;  %4144 = vpow2.f32 %v1540_v37  ;;  %v1293_v48 = vsub.f32 0.0, %v1145_v42  ;;  %3572 = vmatpush3.bf16.msra.mxu1 %v4230_v22  ;;  %2784 = vst [vmem:[#allocation7 + $0x20] sm:$0xff] %v2054_v47  ;;  %v1157_v49 = vpop.f32.mrf.mxu0 }
 0x1f8   :  { %v4121_v50 = vpop.eup %4120  ;;  %4146 = vrcp.f32 %v1668_v44  ;;  %v1671_v51 = vadd.f32 1.0, %v4119_v29  ;;  %v1298_v52 = vsub.f32 0.0, %v1166_v46  ;;  %3573 = vmatprep.subr.bf16.mxu1 %v4231_v21  ;;  %v1158_v53 = vadd.f32 %v4515_v40, %v1157_v49  ;;  %v3366_v54 = vpop.f32.mrf.mxu1 }
 0x1f9   :  { %v4123_v55 = vpop.eup %4122  ;;  %4148 = vpow2.f32 %v1546_v45  ;;  %v1542_v56 = vmul.f32 1.442695, %v1293_v48  ;;  %2787 = vst [vmem:[#allocation7 + $0x38] sm:$0xff] %v3366_v54  ;;  %v3342_v57 = vpop.f32.mrf.mxu0  ;;  %v1992_v28 = vpack.c.bf16 %v4121_v50, %v4113_v36 }
 0x1fa   :  { %v4125_v58 = vpop.eup %4124  ;;  %4150 = vrcp.f32 %v1671_v51  ;;  %v1669_v60 = vadd.f32 1.0, %v4123_v55  ;;  %v1552_v61 = vmul.f32 1.442695, %v1298_v52  ;;  %v1296_v62 = vsub.f32 0.0, %v1158_v53  ;;  %v2057_v16 = vpop.f32.mrf.mxu1 }
 0x1fb   :  { %v4127_v63 = vpop.eup %4126  ;;  %4152 = vpow2.f32 %v1542_v56  ;;  %3574 = vmatpush3.bf16.msra.mxu1 %v4231_v21  ;;  %v1169_v27 = vadd.f32 %v4515_v40, %v3342_v57  ;;  %2785 = vst [vmem:[#allocation7 + $0x28] sm:$0xff] %v2057_v16  ;;  %3559 = vmatprep.mubr.bf16.mxu1 %v1992_v28  ;;  %v1160_v0 = vpop.f32.mrf.mxu0  ;;  %v1993_v5 = vpack.c.bf16 %v4117_v59, %v4125_v58  ;;  %v4235_v59 = vld [vmem:[#allocation2 + $0x1c0] sm:$0xff]  }
 0x1fc   :  { %v4129_v1 = vpop.eup %4128  ;;  %4154 = vrcp.f32 %v1669_v60  ;;  %v1548_v2 = vmul.f32 1.442695, %v1296_v62  ;;  %3575 = vmatprep.subr.bf16.mxu1 %v4232_v3  ;;  %v1161_v4 = vadd.f32 %v4515_v40, %v1160_v0  ;;  %v3369_v20 = vpop.f32.mrf.mxu1  ;;  %v1674_v26 = vadd.f32 1.0, %v4127_v63 }
 0x1fd   :  { %v4131_v6 = vpop.eup %4130  ;;  %4156 = vrcp.f32 %v1670_v17  ;;  %v1299_v7 = vsub.f32 0.0, %v1169_v27  ;;  %2790 = vst [vmem:[#allocation7 + $0x50] sm:$0xff] %v3369_v20 }
 0x1fe   :  { %v4133_v8 = vpop.eup %4132  ;;  %v1672_v9 = vadd.f32 1.0, %v4131_v6  ;;  %4158 = vpow2.f32 %v1552_v61  ;;  %v1297_v10 = vsub.f32 0.0, %v1161_v4  ;;  %3560 = vmatmul.mubr.bf16.gmra.mxu1 %v1993_v5  ;;  %v2070_v31 = vpop.f32.mrf.mxu1 }
 0x1ff   :  { %v4135_v11 = vpop.eup %4134  ;;  %4160 = vpow2.f32 %v1548_v2  ;;  %v1554_v23 = vmul.f32 1.442695, %v1299_v7  ;;  %3576 = vmatpush3.bf16.msra.mxu1 %v4232_v3  ;;  %2788 = vst [vmem:[#allocation7 + $0x40] sm:$0xff] %v2070_v31 }
 0x200   :  { %v4137_v12 = vpop.eup %4136  ;;  %4162 = vrcp.f32 %v1672_v9  ;;  %v1675_v40 = vadd.f32 1.0, %v4135_v11  ;;  %v1550_v13 = vmul.f32 1.442695, %v1297_v10  ;;  %3577 = vmatprep.subr.bf16.mxu1 %v4233_v14  ;;  %v3370_v15 = vpop.f32.mrf.mxu1 }
 0x201   :  { %v4139_v19 = vpop.eup %4138  ;;  %4164 = vpow2.f32 %v1554_v23  ;;  %2791 = vst [vmem:[#allocation7 + $0x58] sm:$0xff] %v3370_v15  ;;  %v1994_v24 = vpack.c.bf16 %v4137_v12, %v4129_v1 }
 0x202   :  { %v4141_v25 = vpop.eup %4140  ;;  %4166 = vrcp.f32 %v1675_v40  ;;  %v1673_v32 = vadd.f32 1.0, %v4139_v19  ;;  %v2073_v33 = vpop.f32.mrf.mxu1 }
 0x203   :  { %v4143_v34 = vpop.eup %4142  ;;  %4168 = vpow2.f32 %v1550_v13  ;;  %3578 = vmatpush3.bf16.msra.mxu1 %v4233_v14  ;;  %2789 = vst [vmem:[#allocation7 + $0x48] sm:$0xff] %v2073_v33  ;;  %3563 = vmatprep.mubr.bf16.mxu1 %v1994_v24  ;;  %v1995_v37 = vpack.c.bf16 %v4133_v8, %v4141_v25 }
 0x204   :  { %v4145_v30 = vpop.eup %4144  ;;  %4170 = vrcp.f32 %v1673_v32  ;;  %3579 = vmatprep.subr.bf16.mxu1 %v4234_v35  ;;  %v3373_v36 = vpop.f32.mrf.mxu1  ;;  %v1678_v29 = vadd.f32 1.0, %v4143_v34 }
 0x205   :  { %v4147_v38 = vpop.eup %4146  ;;  %2794 = vst [vmem:[#allocation7 + $0x70] sm:$0xff] %v3373_v36  ;;  %4172 = vrcp.f32 %v1674_v26  ;;  %v1676_v39 = vadd.f32 1.0, %v4145_v30 }
 0x206   :  { %v4149_v22 = vpop.eup %4148  ;;  %3564 = vmatmul.mubr.bf16.gmra.mxu1 %v1995_v37  ;;  %v2086_v41 = vpop.f32.mrf.mxu1 }
 0x207   :  { %v4151_v18 = vpop.eup %4150  ;;  %3580 = vmatpush3.bf16.msra.mxu1 %v4234_v35  ;;  %2792 = vst [vmem:[#allocation7 + $0x60] sm:$0xff] %v2086_v41  ;;  %v1679_v43 = vadd.f32 1.0, %v4149_v22  ;;  %4174 = vrcp.f32 %v1676_v39 }
 0x208   :  { %v4153_v42 = vpop.eup %4152  ;;  %3581 = vmatprep.subr.bf16.mxu1 %v4235_v59  ;;  %v3374_v44 = vpop.f32.mrf.mxu1 }
 0x209   :  { %v4155_v45 = vpop.eup %4154  ;;  %v1677_v46 = vadd.f32 1.0, %v4153_v42  ;;  %2795 = vst [vmem:[#allocation7 + $0x78] sm:$0xff] %v3374_v44 }
 0x20a   :  { %v4157_v47 = vpop.eup %4156  ;;  %v2089_v48 = vpop.f32.mrf.mxu1  ;;  %v1996_v49 = vpack.c.bf16 %v4155_v45, %v4147_v38 }
 0x20b   :  { %v4159_v50 = vpop.eup %4158  ;;  %4176 = vrcp.f32 %v1677_v46  ;;  %3582 = vmatpush3.bf16.msra.mxu1 %v4235_v59  ;;  %2793 = vst [vmem:[#allocation7 + $0x68] sm:$0xff] %v2089_v48  ;;  %v1997_v52 = vpack.c.bf16 %v4151_v18, %v4157_v47 }
 0x20c   :  { %v4161_v51 = vpop.eup %4160  ;;  %4178 = vrcp.f32 %v1679_v43  ;;  %3583 = vmatprep.mubr.bf16.mxu1 %v1996_v49  ;;  %v1682_v61 = vadd.f32 1.0, %v4159_v50 }
 0x20d   :  { %v4163_v21 = vpop.eup %4162  ;;  %4180 = vrcp.f32 %v1678_v29  ;;  %v1680_v54 = vadd.f32 1.0, %v4161_v51 }
 0x20e   :  { %v4165_v53 = vpop.eup %4164  ;;  %v3393_v55 = vpop.f32.mrf.mxu1  ;;  %3584 = vmatmul.mubr.bf16.vlgmr.msra.gmra.mxu1 %v1997_v52 }
 0x20f   :  { %v4167_v17 = vpop.eup %4166  ;;  %2798 = vst [vmem:[#allocation7 + $0x90] sm:$0xff] %v3393_v55  ;;  %v1683_v57 = vadd.f32 1.0, %v4165_v53  ;;  %4182 = vrcp.f32 %v1680_v54 }
 0x210   :  { %v4169_v56 = vpop.eup %4168  ;;  %v2135_v28 = vpop.f32.mrf.mxu1 }
 0x211   :  { %v4171_v58 = vpop.eup %4170  ;;  %v1681_v60 = vadd.f32 1.0, %v4169_v56  ;;  %2796 = vst [vmem:[#allocation7 + $0x80] sm:$0xff] %v2135_v28 }
 0x212   :  { %v3394_v62 = vpop.f32.mrf.mxu1  ;;  %v1998_v16 = vpack.c.bf16 %v4171_v58, %v4163_v21  ;;  %v4173_v63 = vpop.eup %4172 }
 0x213   :  { %4184 = vrcp.f32 %v1681_v60  ;;  %2799 = vst [vmem:[#allocation7 + $0x98] sm:$0xff] %v3394_v62  ;;  %v1999_v0 = vpack.c.bf16 %v4167_v17, %v4173_v63 }
 0x214   :  { %4186 = vrcp.f32 %v1683_v57  ;;  %v2138_v27 = vpop.f32.mrf.mxu1  ;;  %3587 = vmatprep.mubr.bf16.mxu1 %v1998_v16  ;;  %v4175_v2 = vpop.eup %4174 }
 0x215   :  { %2797 = vst [vmem:[#allocation7 + $0x88] sm:$0xff] %v2138_v27  ;;  %4188 = vrcp.f32 %v1682_v61 }
 0x216   :  { %v3397_v1 = vpop.f32.mrf.mxu1  ;;  %3588 = vmatmul.mubr.bf16.gmra.mxu1 %v1999_v0 }
 0x217   :  { %2802 = vst [vmem:[#allocation7 + $0xb0] sm:$0xff] %v3397_v1 }
 0x218   :  { %v4177_v3 = vpop.eup %4176  ;;  %v2151_v4 = vpop.f32.mrf.mxu1 }
 0x219   :  { %v4179_v20 = vpop.eup %4178  ;;  %2800 = vst [vmem:[#allocation7 + $0xa0] sm:$0xff] %v2151_v4  ;;  %v2000_v5 = vpack.c.bf16 %v4177_v3, %v4175_v2 }
 0x21a   :  { %v3398_v6 = vpop.f32.mrf.mxu1  ;;  %v4181_v7 = vpop.eup %4180 }
 0x21b   :  { %2803 = vst [vmem:[#allocation7 + $0xb8] sm:$0xff] %v3398_v6  ;;  %3591 = vmatprep.mubr.bf16.mxu1 %v2000_v5  ;;  %v2001_v9 = vpack.c.bf16 %v4179_v20, %v4181_v7 }
 0x21c   :  { %v2154_v8 = vpop.f32.mrf.mxu1  ;;  %v4183_v31 = vpop.eup %4182 }
 0x21d   :  { %2801 = vst [vmem:[#allocation7 + $0xa8] sm:$0xff] %v2154_v8 }
 0x21e   :  { %v3401_v10 = vpop.f32.mrf.mxu1  ;;  %3592 = vmatmul.mubr.bf16.gmra.mxu1 %v2001_v9 }
 0x21f   :  { %2806 = vst [vmem:[#allocation7 + $0xd0] sm:$0xff] %v3401_v10 }
 0x220   :  { %v4185_v11 = vpop.eup %4184  ;;  %v2167_v23 = vpop.f32.mrf.mxu1 }
 0x221   :  { %v4187_v12 = vpop.eup %4186  ;;  %2804 = vst [vmem:[#allocation7 + $0xc0] sm:$0xff] %v2167_v23  ;;  %v2002_v40 = vpack.c.bf16 %v4185_v11, %v4183_v31 }
 0x222   :  { %v3402_v13 = vpop.f32.mrf.mxu1  ;;  %v4189_v14 = vpop.eup %4188 }
 0x223   :  { %2807 = vst [vmem:[#allocation7 + $0xd8] sm:$0xff] %v3402_v13  ;;  %3595 = vmatprep.mubr.bf16.mxu1 %v2002_v40  ;;  %v2003_v19 = vpack.c.bf16 %v4187_v12, %v4189_v14 }
 0x224   :  { %v2170_v15 = vpop.f32.mrf.mxu1 }
 0x225   :  { %2805 = vst [vmem:[#allocation7 + $0xc8] sm:$0xff] %v2170_v15 }
 0x226   :  { %v3405_v24 = vpop.f32.mrf.mxu1  ;;  %3596 = vmatmul.mubr.bf16.gmra.mxu1 %v2003_v19 }
 0x227   :  { %2810 = vst [vmem:[#allocation7 + $0xf0] sm:$0xff] %v3405_v24 }
 0x228   :  { %v2183_v25 = vpop.f32.mrf.mxu1 }
 0x229   :  { %2808 = vst [vmem:[#allocation7 + $0xe0] sm:$0xff] %v2183_v25 }
 0x22a   :  { %v3406_v26 = vpop.f32.mrf.mxu1 }
 0x22b   :  { %2811 = vst [vmem:[#allocation7 + $0xf8] sm:$0xff] %v3406_v26 }
 0x22c   :  { %v2186_v32 = vpop.f32.mrf.mxu1 }
 0x22d   :  { %2809 = vst [vmem:[#allocation7 + $0xe8] sm:$0xff] %v2186_v32 }
 0x22e   :  { %v3425_v33 = vpop.f32.mrf.mxu1 }
 0x22f   :  { %2814 = vst [vmem:[#allocation7 + $0x110] sm:$0xff] %v3425_v33 }
 0x230   :  { %v2232_v34 = vpop.f32.mrf.mxu1 }
 0x231   :  { %2812 = vst [vmem:[#allocation7 + $0x100] sm:$0xff] %v2232_v34 }
 0x232   :  { %v3426_v30 = vpop.f32.mrf.mxu1 }
 0x233   :  { %2815 = vst [vmem:[#allocation7 + $0x118] sm:$0xff] %v3426_v30 }
 0x234   :  { %v2235_v35 = vpop.f32.mrf.mxu1 }
 0x235   :  { %2813 = vst [vmem:[#allocation7 + $0x108] sm:$0xff] %v2235_v35 }
 0x236   :  { %v3429_v36 = vpop.f32.mrf.mxu1 }
 0x237   :  { %2818 = vst [vmem:[#allocation7 + $0x130] sm:$0xff] %v3429_v36 }
 0x238   :  { %v2248_v37 = vpop.f32.mrf.mxu1 }
 0x239   :  { %2816 = vst [vmem:[#allocation7 + $0x120] sm:$0xff] %v2248_v37 }
 0x23a   :  { %v3430_v38 = vpop.f32.mrf.mxu1 }
 0x23b   :  { %2819 = vst [vmem:[#allocation7 + $0x138] sm:$0xff] %v3430_v38 }
 0x23c   :  { %v2251_v22 = vpop.f32.mrf.mxu1 }
 0x23d   :  { %2817 = vst [vmem:[#allocation7 + $0x128] sm:$0xff] %v2251_v22 }
 0x23e   :  { %v3433_v39 = vpop.f32.mrf.mxu1 }
 0x23f   :  { %2822 = vst [vmem:[#allocation7 + $0x150] sm:$0xff] %v3433_v39 }
 0x240   :  { %v2264_v41 = vpop.f32.mrf.mxu1 }
 0x241   :  { %2820 = vst [vmem:[#allocation7 + $0x140] sm:$0xff] %v2264_v41 }
 0x242   :  { %v3434_v18 = vpop.f32.mrf.mxu1 }
 0x243   :  { %2823 = vst [vmem:[#allocation7 + $0x158] sm:$0xff] %v3434_v18 }
 0x244   :  { %v2267_v42 = vpop.f32.mrf.mxu1 }
 0x245   :  { %2821 = vst [vmem:[#allocation7 + $0x148] sm:$0xff] %v2267_v42 }
 0x246   :  { %v3437_v43 = vpop.f32.mrf.mxu1 }
 0x247   :  { %2826 = vst [vmem:[#allocation7 + $0x170] sm:$0xff] %v3437_v43 }
 0x248   :  { %v2280_v59 = vpop.f32.mrf.mxu1 }
 0x249   :  { %2824 = vst [vmem:[#allocation7 + $0x160] sm:$0xff] %v2280_v59 }
 0x24a   :  { %v3438_v44 = vpop.f32.mrf.mxu1 }
 0x24b   :  { %2827 = vst [vmem:[#allocation7 + $0x178] sm:$0xff] %v3438_v44 }
 0x24c   :  { %v2283_v45 = vpop.f32.mrf.mxu1 }
 0x24d   :  { %2825 = vst [vmem:[#allocation7 + $0x168] sm:$0xff] %v2283_v45 }
 0x24e   :  { %v3457_v46 = vpop.f32.mrf.mxu1 }
 0x24f   :  { %2830 = vst [vmem:[#allocation7 + $0x190] sm:$0xff] %v3457_v46 }
 0x250   :  { %v2329_v47 = vpop.f32.mrf.mxu1 }
 0x251   :  { %2828 = vst [vmem:[#allocation7 + $0x180] sm:$0xff] %v2329_v47 }
 0x252   :  { %v3458_v29 = vpop.f32.mrf.mxu1 }
 0x253   :  { %2831 = vst [vmem:[#allocation7 + $0x198] sm:$0xff] %v3458_v29 }
 0x254   :  { %v2332_v48 = vpop.f32.mrf.mxu1 }
 0x255   :  { %2829 = vst [vmem:[#allocation7 + $0x188] sm:$0xff] %v2332_v48 }
 0x256   :  { %v3461_v49 = vpop.f32.mrf.mxu1 }
 0x257   :  { %2834 = vst [vmem:[#allocation7 + $0x1b0] sm:$0xff] %v3461_v49 }
 0x258   :  { %v2345_v50 = vpop.f32.mrf.mxu1 }
 0x259   :  { %2832 = vst [vmem:[#allocation7 + $0x1a0] sm:$0xff] %v2345_v50 }
 0x25a   :  { %v3462_v51 = vpop.f32.mrf.mxu1 }
 0x25b   :  { %2835 = vst [vmem:[#allocation7 + $0x1b8] sm:$0xff] %v3462_v51 }
 0x25c   :  { %v2348_v52 = vpop.f32.mrf.mxu1 }
 0x25d   :  { %2833 = vst [vmem:[#allocation7 + $0x1a8] sm:$0xff] %v2348_v52 }
 0x25e   :  { %v3465_v21 = vpop.f32.mrf.mxu1 }
 0x25f   :  { %2838 = vst [vmem:[#allocation7 + $0x1d0] sm:$0xff] %v3465_v21 }
 0x260   :  { %v2361_v53 = vpop.f32.mrf.mxu1 }
 0x261   :  { %2836 = vst [vmem:[#allocation7 + $0x1c0] sm:$0xff] %v2361_v53 }
 0x262   :  { %v3466_v54 = vpop.f32.mrf.mxu1 }
 0x263   :  { %2839 = vst [vmem:[#allocation7 + $0x1d8] sm:$0xff] %v3466_v54 }
 0x264   :  { %v2364_v55 = vpop.f32.mrf.mxu1 }
 0x265   :  { %2837 = vst [vmem:[#allocation7 + $0x1c8] sm:$0xff] %v2364_v55 }
 0x266   :  { %v3469_v17 = vpop.f32.mrf.mxu1 }
 0x267   :  { %2842 = vst [vmem:[#allocation7 + $0x1f0] sm:$0xff] %v3469_v17 }
 0x268   :  { %v2377_v56 = vpop.f32.mrf.mxu1 }
 0x269   :  { %2840 = vst [vmem:[#allocation7 + $0x1e0] sm:$0xff] %v2377_v56 }
 0x26a   :  { %v3470_v57 = vpop.f32.mrf.mxu1 }
 0x26b   :  { %2843 = vst [vmem:[#allocation7 + $0x1f8] sm:$0xff] %v3470_v57 }
 0x26c   :  { %v2380_v28 = vpop.f32.mrf.mxu1 }
 0x26d   :  { %2841 = vst [vmem:[#allocation7 + $0x1e8] sm:$0xff] %v2380_v28 }
 0x26e   :  { %v3489_v58 = vpop.f32.mrf.mxu1 }
 0x26f   :  { %2846 = vst [vmem:[#allocation7 + $0x210] sm:$0xff] %v3489_v58 }
 0x270   :  { %v2426_v60 = vpop.f32.mrf.mxu1 }
 0x271   :  { %2844 = vst [vmem:[#allocation7 + $0x200] sm:$0xff] %v2426_v60 }
 0x272   :  { %v3490_v61 = vpop.f32.mrf.mxu1 }
 0x273   :  { %2847 = vst [vmem:[#allocation7 + $0x218] sm:$0xff] %v3490_v61 }
 0x274   :  { %v2429_v62 = vpop.f32.mrf.mxu1 }
 0x275   :  { %2845 = vst [vmem:[#allocation7 + $0x208] sm:$0xff] %v2429_v62 }
 0x276   :  { %v3493_v16 = vpop.f32.mrf.mxu1 }
 0x277   :  { %2850 = vst [vmem:[#allocation7 + $0x230] sm:$0xff] %v3493_v16 }
 0x278   :  { %v2442_v63 = vpop.f32.mrf.mxu1 }
 0x279   :  { %2848 = vst [vmem:[#allocation7 + $0x220] sm:$0xff] %v2442_v63 }
 0x27a   :  { %v3494_v27 = vpop.f32.mrf.mxu1 }
 0x27b   :  { %2851 = vst [vmem:[#allocation7 + $0x238] sm:$0xff] %v3494_v27 }
 0x27c   :  { %v2445_v0 = vpop.f32.mrf.mxu1 }
 0x27d   :  { %2849 = vst [vmem:[#allocation7 + $0x228] sm:$0xff] %v2445_v0 }
 0x27e   :  { %v3497_v1 = vpop.f32.mrf.mxu1 }
 0x27f   :  { %2854 = vst [vmem:[#allocation7 + $0x250] sm:$0xff] %v3497_v1 }
 0x280   :  { %v2458_v2 = vpop.f32.mrf.mxu1 }
 0x281   :  { %2852 = vst [vmem:[#allocation7 + $0x240] sm:$0xff] %v2458_v2 }
 0x282   :  { %v3498_v3 = vpop.f32.mrf.mxu1 }
 0x283   :  { %2855 = vst [vmem:[#allocation7 + $0x258] sm:$0xff] %v3498_v3 }
 0x284   :  { %v2461_v4 = vpop.f32.mrf.mxu1 }
 0x285   :  { %2853 = vst [vmem:[#allocation7 + $0x248] sm:$0xff] %v2461_v4 }
 0x286   :  { %v3501_v20 = vpop.f32.mrf.mxu1 }
 0x287   :  { %2858 = vst [vmem:[#allocation7 + $0x270] sm:$0xff] %v3501_v20 }
 0x288   :  { %v2474_v5 = vpop.f32.mrf.mxu1 }
 0x289   :  { %2856 = vst [vmem:[#allocation7 + $0x260] sm:$0xff] %v2474_v5 }
 0x28a   :  { %v3502_v6 = vpop.f32.mrf.mxu1 }
 0x28b   :  { %2859 = vst [vmem:[#allocation7 + $0x278] sm:$0xff] %v3502_v6 }
 0x28c   :  { %v2477_v7 = vpop.f32.mrf.mxu1 }
 0x28d   :  { %2857 = vst [vmem:[#allocation7 + $0x268] sm:$0xff] %v2477_v7 }
 0x28e   :  { %v3521_v8 = vpop.f32.mrf.mxu1 }
 0x28f   :  { %2862 = vst [vmem:[#allocation7 + $0x290] sm:$0xff] %v3521_v8 }
 0x290   :  { %v2523_v9 = vpop.f32.mrf.mxu1 }
 0x291   :  { %2860 = vst [vmem:[#allocation7 + $0x280] sm:$0xff] %v2523_v9 }
 0x292   :  { %v3522_v10 = vpop.f32.mrf.mxu1 }
 0x293   :  { %2863 = vst [vmem:[#allocation7 + $0x298] sm:$0xff] %v3522_v10 }
 0x294   :  { %v2526_v31 = vpop.f32.mrf.mxu1 }
 0x295   :  { %2861 = vst [vmem:[#allocation7 + $0x288] sm:$0xff] %v2526_v31 }
 0x296   :  { %v3525_v11 = vpop.f32.mrf.mxu1 }
 0x297   :  { %2866 = vst [vmem:[#allocation7 + $0x2b0] sm:$0xff] %v3525_v11 }
 0x298   :  { %v2539_v23 = vpop.f32.mrf.mxu1 }
 0x299   :  { %2864 = vst [vmem:[#allocation7 + $0x2a0] sm:$0xff] %v2539_v23 }
 0x29a   :  { %v3526_v12 = vpop.f32.mrf.mxu1 }
 0x29b   :  { %2867 = vst [vmem:[#allocation7 + $0x2b8] sm:$0xff] %v3526_v12 }
 0x29c   :  { %v2542_v40 = vpop.f32.mrf.mxu1 }
 0x29d   :  { %2865 = vst [vmem:[#allocation7 + $0x2a8] sm:$0xff] %v2542_v40 }
 0x29e   :  { %v3529_v13 = vpop.f32.mrf.mxu1 }
 0x29f   :  { %2870 = vst [vmem:[#allocation7 + $0x2d0] sm:$0xff] %v3529_v13 }
 0x2a0   :  { %v2555_v14 = vpop.f32.mrf.mxu1 }
 0x2a1   :  { %2868 = vst [vmem:[#allocation7 + $0x2c0] sm:$0xff] %v2555_v14 }
 0x2a2   :  { %v3530_v15 = vpop.f32.mrf.mxu1 }
 0x2a3   :  { %2871 = vst [vmem:[#allocation7 + $0x2d8] sm:$0xff] %v3530_v15 }
 0x2a4   :  { %v2558_v19 = vpop.f32.mrf.mxu1 }
 0x2a5   :  { %2869 = vst [vmem:[#allocation7 + $0x2c8] sm:$0xff] %v2558_v19 }
 0x2a6   :  { %v3533_v24 = vpop.f32.mrf.mxu1 }
 0x2a7   :  { %2874 = vst [vmem:[#allocation7 + $0x2f0] sm:$0xff] %v3533_v24 }
 0x2a8   :  { %v2571_v25 = vpop.f32.mrf.mxu1 }
 0x2a9   :  { %2872 = vst [vmem:[#allocation7 + $0x2e0] sm:$0xff] %v2571_v25 }
 0x2aa   :  { %v3534_v26 = vpop.f32.mrf.mxu1 }
 0x2ab   :  { %2875 = vst [vmem:[#allocation7 + $0x2f8] sm:$0xff] %v3534_v26 }
 0x2ac   :  { %v2574_v32 = vpop.f32.mrf.mxu1 }
 0x2ad   :  { %2873 = vst [vmem:[#allocation7 + $0x2e8] sm:$0xff] %v2574_v32 }
 0x2ae   :  { %v3553_v33 = vpop.f32.mrf.mxu1 }
 0x2af   :  { %2878 = vst [vmem:[#allocation7 + $0x310] sm:$0xff] %v3553_v33 }
 0x2b0   :  { %v2620_v34 = vpop.f32.mrf.mxu1 }
 0x2b1   :  { %2876 = vst [vmem:[#allocation7 + $0x300] sm:$0xff] %v2620_v34 }
 0x2b2   :  { %v3554_v30 = vpop.f32.mrf.mxu1 }
 0x2b3   :  { %2879 = vst [vmem:[#allocation7 + $0x318] sm:$0xff] %v3554_v30 }
 0x2b4   :  { %v2623_v35 = vpop.f32.mrf.mxu1 }
 0x2b5   :  { %2877 = vst [vmem:[#allocation7 + $0x308] sm:$0xff] %v2623_v35 }
 0x2b6   :  { %v3557_v36 = vpop.f32.mrf.mxu1 }
 0x2b7   :  { %2882 = vst [vmem:[#allocation7 + $0x330] sm:$0xff] %v3557_v36 }
 0x2b8   :  { %v2636_v37 = vpop.f32.mrf.mxu1 }
 0x2b9   :  { %2880 = vst [vmem:[#allocation7 + $0x320] sm:$0xff] %v2636_v37 }
 0x2ba   :  { %v3558_v38 = vpop.f32.mrf.mxu1 }
 0x2bb   :  { %2883 = vst [vmem:[#allocation7 + $0x338] sm:$0xff] %v3558_v38 }
 0x2bc   :  { %v2639_v22 = vpop.f32.mrf.mxu1 }
 0x2bd   :  { %2881 = vst [vmem:[#allocation7 + $0x328] sm:$0xff] %v2639_v22 }
 0x2be   :  { %v3561_v39 = vpop.f32.mrf.mxu1 }
 0x2bf   :  { %2886 = vst [vmem:[#allocation7 + $0x350] sm:$0xff] %v3561_v39 }
 0x2c0   :  { %v2652_v41 = vpop.f32.mrf.mxu1 }
 0x2c1   :  { %2884 = vst [vmem:[#allocation7 + $0x340] sm:$0xff] %v2652_v41 }
 0x2c2   :  { %v3562_v18 = vpop.f32.mrf.mxu1 }
 0x2c3   :  { %2887 = vst [vmem:[#allocation7 + $0x358] sm:$0xff] %v3562_v18 }
 0x2c4   :  { %v2655_v42 = vpop.f32.mrf.mxu1 }
 0x2c5   :  { %2885 = vst [vmem:[#allocation7 + $0x348] sm:$0xff] %v2655_v42 }
 0x2c6   :  { %v3565_v43 = vpop.f32.mrf.mxu1 }
 0x2c7   :  { %2890 = vst [vmem:[#allocation7 + $0x370] sm:$0xff] %v3565_v43 }
 0x2c8   :  { %v2668_v59 = vpop.f32.mrf.mxu1 }
 0x2c9   :  { %2888 = vst [vmem:[#allocation7 + $0x360] sm:$0xff] %v2668_v59 }
 0x2ca   :  { %v3566_v44 = vpop.f32.mrf.mxu1 }
 0x2cb   :  { %2891 = vst [vmem:[#allocation7 + $0x378] sm:$0xff] %v3566_v44 }
 0x2cc   :  { %v2671_v45 = vpop.f32.mrf.mxu1 }
 0x2cd   :  { %2889 = vst [vmem:[#allocation7 + $0x368] sm:$0xff] %v2671_v45 }
 0x2ce   :  { %v3585_v46 = vpop.f32.mrf.mxu1 }
 0x2cf   :  { %2894 = vst [vmem:[#allocation7 + $0x390] sm:$0xff] %v3585_v46 }
 0x2d0   :  { %v2717_v47 = vpop.f32.mrf.mxu1 }
 0x2d1   :  { %2892 = vst [vmem:[#allocation7 + $0x380] sm:$0xff] %v2717_v47 }
 0x2d2   :  { %v3586_v29 = vpop.f32.mrf.mxu1 }
 0x2d3   :  { %2895 = vst [vmem:[#allocation7 + $0x398] sm:$0xff] %v3586_v29 }
 0x2d4   :  { %v2720_v48 = vpop.f32.mrf.mxu1 }
 0x2d5   :  { %2893 = vst [vmem:[#allocation7 + $0x388] sm:$0xff] %v2720_v48 }
 0x2d6   :  { %v3589_v49 = vpop.f32.mrf.mxu1 }
 0x2d7   :  { %2898 = vst [vmem:[#allocation7 + $0x3b0] sm:$0xff] %v3589_v49 }
 0x2d8   :  { %v2733_v50 = vpop.f32.mrf.mxu1 }
 0x2d9   :  { %2896 = vst [vmem:[#allocation7 + $0x3a0] sm:$0xff] %v2733_v50 }
 0x2da   :  { %v3590_v51 = vpop.f32.mrf.mxu1 }
 0x2db   :  { %2899 = vst [vmem:[#allocation7 + $0x3b8] sm:$0xff] %v3590_v51 }
 0x2dc   :  { %v2736_v52 = vpop.f32.mrf.mxu1 }
 0x2dd   :  { %2897 = vst [vmem:[#allocation7 + $0x3a8] sm:$0xff] %v2736_v52 }
 0x2de   :  { %v3593_v21 = vpop.f32.mrf.mxu1 }
 0x2df   :  { %2902 = vst [vmem:[#allocation7 + $0x3d0] sm:$0xff] %v3593_v21 }
 0x2e0   :  { %v2749_v53 = vpop.f32.mrf.mxu1 }
 0x2e1   :  { %2900 = vst [vmem:[#allocation7 + $0x3c0] sm:$0xff] %v2749_v53 }
 0x2e2   :  { %v3594_v54 = vpop.f32.mrf.mxu1 }
 0x2e3   :  { %2903 = vst [vmem:[#allocation7 + $0x3d8] sm:$0xff] %v3594_v54 }
 0x2e4   :  { %v2752_v55 = vpop.f32.mrf.mxu1 }
 0x2e5   :  { %2901 = vst [vmem:[#allocation7 + $0x3c8] sm:$0xff] %v2752_v55 }
 0x2e6   :  { %v3597_v17 = vpop.f32.mrf.mxu1 }
 0x2e7   :  { %2906 = vst [vmem:[#allocation7 + $0x3f0] sm:$0xff] %v3597_v17 }
 0x2e8   :  { %v2765_v56 = vpop.f32.mrf.mxu1 }
 0x2e9   :  { %2904 = vst [vmem:[#allocation7 + $0x3e0] sm:$0xff] %v2765_v56 }
 0x2ea   :  { %v3598_v57 = vpop.f32.mrf.mxu1 }
 0x2eb   :  { %2907 = vst [vmem:[#allocation7 + $0x3f8] sm:$0xff] %v3598_v57 }
 0x2ec   :  { %v2768_v28 = vpop.f32.mrf.mxu1 }
 0x2ed   :  { %2905 = vst [vmem:[#allocation7 + $0x3e8] sm:$0xff] %v2768_v28 }
 0x2ee   :  { %4287 = shalt.err (!%p4284_p0)
}
 0x2ef   :  { %s4307_s30 = smov 128   ;;  %s4308_s4 = smov 8  }
 0x2f0   :  { %2919 = dma.vmem_to_hbm [thread:$0]  %s2914_s28, 16384, %s4554_s3, [#allocation4], %s4307_s30, %s4307_s30, %s4308_s4  }
 0x2f1   :  { %4300 = dma.done.wait [#allocation4], 16384  }
 0x2f2   :  { %4301 = vsyncadd [#allocation4], 4294950912 }
 0x2f3   :  { %2923 = vsyncpa [#allocation3], 1 }
 0x2f4   :  { %2924 = vsyncpa [#allocation6], 1 }
 0x2f5   :  { %2925 = vsyncpa [#allocation4], 1 }

</bundles_post_ra>
